<compile_context>
chip_gen: v5e
topology: v5e:2x2
jax: 0.10.0
libtpu: 0.0.40
codegen_flags: <defaults>
</compile_context>

<pallas_src>
import functools

import jax
import jax.numpy as jnp
from jax.experimental import pallas as pl
from jax.experimental.pallas import tpu as pltpu

LANE = 128                   # every matmul N / K dim is padded to lane width
SUBLANE = 8
MAX_ROW_TILE = 2048          # bf16 row tiles: ~4 MiB/step worst case -> fits v5e/v6e/v7x
MIN_ROWS_PER_SPLIT = 64      # force >=2 grid steps (v7x megacore) once rows >= 2*this
VMEM_LIMIT_BYTES = 32 * 1024 * 1024   # >= scoped defaults on v5e(16M)/v6e(32M)/v7x(32M)


def _round_up(x, m):
    return ((x + m - 1) // m) * m


def _cdiv(a, b):
    return (a + b - 1) // b


def _row_tiling(m):
    """Pick (padded_rows, row_tile): sublane-aligned near-divisor tiles (no
    huge zero-row padding), <= MAX_ROW_TILE, and >=2 grid steps when there is
    enough work for both v7x TensorCores to get a share."""
    mp = _round_up(m, SUBLANE)
    steps = _cdiv(mp, MAX_ROW_TILE)
    if mp >= 2 * MIN_ROWS_PER_SPLIT:
        steps = max(steps, 2)
    tm = _round_up(_cdiv(mp, steps), SUBLANE)
    mp = _round_up(mp, tm)
    return mp, tm


# ---------------------------------------------------------------------------
# Pallas kernels
# ---------------------------------------------------------------------------
def _conv_pool_kernel(p_ref, w_ref, b_ref, o_ref, *, tm):
    """Fused conv-as-matmul + bias + ReLU + 2x2 maxpool.

    p_ref : (4*tm, Kp) bf16 im2col patches; rows [c*tm:(c+1)*tm) belong to
            pooling-window corner c, ordered (b, pooled_i, pooled_j).
    w_ref : (Kp, 128) bf16 packed conv weight (zero-padded rows / out channels).
    b_ref : (1, 128)  f32 packed bias (zero-padded).
    o_ref : (tm, 128) bf16 pooled NHWC output rows (lane-dense stores).

    One MXU matmul per grid step; the 2x2 pool is an elementwise max over the
    four sublane-aligned tm-row slices of the result.  relu(max_c(x_c@W)+b) ==
    max_c(relu(x_c@W+b)) since relu is monotone and the bias is corner-shared.
    """
    y = jnp.dot(p_ref[...], w_ref[...], preferred_element_type=jnp.float32)
    pooled = jnp.maximum(jnp.maximum(y[0 * tm:1 * tm], y[1 * tm:2 * tm]),
                         jnp.maximum(y[2 * tm:3 * tm], y[3 * tm:4 * tm]))
    o_ref[...] = jnp.maximum(pooled + b_ref[...], 0.0).astype(o_ref.dtype)


def _fc_fused_kernel(x_ref, w1_ref, b1_ref, w2_ref, b2_ref, w3_ref, b3_ref, o_ref):
    """fc1+ReLU -> fc2+ReLU -> fc3 in one launch; bf16 MXU operands, f32 accum."""
    h = jnp.dot(x_ref[...], w1_ref[...], preferred_element_type=jnp.float32)
    h = jnp.maximum(h + b1_ref[...], 0.0)
    h = jnp.dot(h.astype(jnp.bfloat16), w2_ref[...], preferred_element_type=jnp.float32)
    h = jnp.maximum(h + b2_ref[...], 0.0)
    h = jnp.dot(h.astype(jnp.bfloat16), w3_ref[...], preferred_element_type=jnp.float32)
    o_ref[...] = (h + b3_ref[...]).astype(o_ref.dtype)


# ---------------------------------------------------------------------------
# Wrappers
# ---------------------------------------------------------------------------
def conv_relu_pool(x, w_packed, b_packed, *, k, out_channels):
    """Valid kxk conv (stride 1) + bias + ReLU + MaxPool(2,2) on NHWC bf16 input."""
    B, H, W, C = x.shape
    OH, OW = H - k + 1, W - k + 1
    PH, PW = OH // 2, OW // 2
    K = k * k * C
    Kp = _round_up(K, LANE)           # dense unmasked lane loads
    M = B * PH * PW
    Np = w_packed.shape[1]            # 128

    # im2col patches grouped by pooling-window corner (r, c); feature order is
    # (di, dj, channel) to match the packed weight rows.  Pure XLA slicing.
    def corner(r, c):
        parts = [x[:, di + r: di + r + 2 * PH: 2, dj + c: dj + c + 2 * PW: 2, :]
                 for di in range(k) for dj in range(k)]
        return jnp.concatenate(parts, axis=-1).reshape(M, K)

    patches = jnp.stack([corner(0, 0), corner(0, 1), corner(1, 0), corner(1, 1)],
                        axis=0).astype(jnp.bfloat16)                 # (4, M, K)

    Mp, tm = _row_tiling(M)
    patches = jnp.pad(patches, ((0, 0), (0, Mp - M), (0, Kp - K)))   # (4, Mp, Kp)
    # Interleave the corners per row-tile so each grid step reads ONE contiguous
    # (4*tm, Kp) slab (one DMA + one matmul per step instead of four).
    patches = (patches.reshape(4, Mp // tm, tm, Kp)
               .transpose(1, 0, 2, 3)
               .reshape(4 * Mp, Kp))

    out = pl.pallas_call(
        functools.partial(_conv_pool_kernel, tm=tm),
        out_shape=jax.ShapeDtypeStruct((Mp, Np), jnp.bfloat16),
        grid=(Mp // tm,),
        in_specs=[pl.BlockSpec((4 * tm, Kp), lambda m: (m, 0)),
                  pl.BlockSpec((Kp, Np), lambda m: (0, 0)),
                  pl.BlockSpec((1, Np), lambda m: (0, 0))],
        out_specs=pl.BlockSpec((tm, Np), lambda m: (m, 0)),
        compiler_params=pltpu.CompilerParams(
            dimension_semantics=("parallel",),
            vmem_limit_bytes=VMEM_LIMIT_BYTES),
    )(patches, w_packed, b_packed)

    # Drop row padding, restore NHWC, drop the (exactly-zero) padded channels.
    return out[:M].reshape(B, PH, PW, Np)[:, :, :, :out_channels]


def fc_fused(x, packed, *, out_channel):
    """fc1(400->120)+ReLU, fc2(120->84)+ReLU, fc3(84->out) in one pallas_call."""
    B, K1 = x.shape
    K1p = _round_up(K1, LANE)                     # 400 -> 512 (dense loads)
    Mp, tm = _row_tiling(B)                       # pad batch rows to >= 8 sublanes
    xp = jnp.pad(x.astype(jnp.bfloat16), ((0, Mp - B), (0, K1p - K1)))

    out = pl.pallas_call(
        _fc_fused_kernel,
        out_shape=jax.ShapeDtypeStruct((Mp, LANE), jnp.float32),
        grid=(Mp // tm,),
        in_specs=[pl.BlockSpec((tm, K1p), lambda m: (m, 0)),
                  pl.BlockSpec((K1p, LANE), lambda m: (0, 0)),
                  pl.BlockSpec((1, LANE), lambda m: (0, 0)),
                  pl.BlockSpec((LANE, LANE), lambda m: (0, 0)),
                  pl.BlockSpec((1, LANE), lambda m: (0, 0)),
                  pl.BlockSpec((LANE, LANE), lambda m: (0, 0)),
                  pl.BlockSpec((1, LANE), lambda m: (0, 0))],
        out_specs=pl.BlockSpec((tm, LANE), lambda m: (m, 0)),
        compiler_params=pltpu.CompilerParams(
            dimension_semantics=("parallel",),
            vmem_limit_bytes=VMEM_LIMIT_BYTES),
    )(xp, packed["fc1_w"], packed["fc1_b"], packed["fc2_w"], packed["fc2_b"],
      packed["fc3_w"], packed["fc3_b"])
    return out[:B, :out_channel]


# ---------------------------------------------------------------------------
# Parameters: torch-layout init, then one-time packing for the kernels
# ---------------------------------------------------------------------------
def init_params(key, in_channel, out_channel):
    """PyTorch-default-style uniform init, in the original torch layouts (f32)."""
    def uniform(key, shape, fan_in):
        bound = 1.0 / jnp.sqrt(float(fan_in))
        return jax.random.uniform(key, shape, jnp.float32, -bound, bound)

    ks = jax.random.split(key, 10)
    return {
        "conv1_w": uniform(ks[0], (6, in_channel, 5, 5), in_channel * 25),
        "conv1_b": uniform(ks[1], (6,), in_channel * 25),
        "conv2_w": uniform(ks[2], (16, 6, 5, 5), 6 * 25),
        "conv2_b": uniform(ks[3], (16,), 6 * 25),
        "fc1_w": uniform(ks[4], (120, 16 * 5 * 5), 16 * 5 * 5),
        "fc1_b": uniform(ks[5], (120,), 16 * 5 * 5),
        "fc2_w": uniform(ks[6], (84, 120), 120),
        "fc2_b": uniform(ks[7], (84,), 120),
        "fc3_w": uniform(ks[8], (out_channel, 84), 84),
        "fc3_b": uniform(ks[9], (out_channel,), 84),
    }


def pack_params(p):
    """One-time transpose / permute / zero-pad / bf16-cast so every kernel
    matmul is bf16 (M, Kp) @ (Kp, 128) with lane-dense outputs.  Zero padding
    keeps the fused fc chain exact (padded rows/cols contribute nothing)."""
    def pad_to(a, rows, cols):
        return jnp.pad(a, ((0, rows - a.shape[0]), (0, cols - a.shape[1])))

    def pad_bias(b):
        return jnp.pad(b, (0, LANE - b.shape[0])).reshape(1, LANE).astype(jnp.float32)

    def pack_conv(w):              # (O, C, k, k) -> (round_up(k*k*C), 128), rows (di, dj, c)
        O, C, k, _ = w.shape
        K = k * k * C
        wm = jnp.transpose(w, (2, 3, 1, 0)).reshape(K, O)
        return pad_to(wm, _round_up(K, LANE), LANE).astype(jnp.bfloat16)

    # fc1 columns permuted from torch's NCHW flatten order (c, i, j) to our
    # NHWC flatten order (i, j, c), then transposed to (K, N).
    fc1 = p["fc1_w"].reshape(120, 16, 5, 5).transpose(0, 2, 3, 1).reshape(120, 400).T

    return {
        "conv1_w": pack_conv(p["conv1_w"]), "conv1_b": pad_bias(p["conv1_b"]),
        "conv2_w": pack_conv(p["conv2_w"]), "conv2_b": pad_bias(p["conv2_b"]),
        "fc1_w": pad_to(fc1, _round_up(400, LANE), LANE).astype(jnp.bfloat16),
        "fc1_b": pad_bias(p["fc1_b"]),
        "fc2_w": pad_to(p["fc2_w"].T, LANE, LANE).astype(jnp.bfloat16),
        "fc2_b": pad_bias(p["fc2_b"]),
        "fc3_w": pad_to(p["fc3_w"].T, LANE, LANE).astype(jnp.bfloat16),
        "fc3_b": pad_bias(p["fc3_b"]),
    }


# ---------------------------------------------------------------------------
# Forward pass (mirrors Net.forward) + pure-XLA f32 reference for validation
# ---------------------------------------------------------------------------
def net_forward(packed, x, *, out_channel):
    """x is NCHW f32 at the module boundary (PyTorch convention)."""
    x = jnp.transpose(x, (0, 2, 3, 1)).astype(jnp.bfloat16)   # one NCHW->NHWC + bf16 cast
    h = conv_relu_pool(x, packed["conv1_w"], packed["conv1_b"], k=5, out_channels=6)
    h = conv_relu_pool(h, packed["conv2_w"], packed["conv2_b"], k=5, out_channels=16)
    h = h.reshape(h.shape[0], 5 * 5 * 16)                     # NHWC flatten (i, j, c)
    return fc_fused(h, packed, out_channel=out_channel)


def reference_forward(p, x):
    """Pure-JAX/XLA f32 reference of the PyTorch module (NCHW, torch layouts)."""
    hi = jax.lax.Precision.HIGHEST

    def conv(x, w, b):
        y = jax.lax.conv_general_dilated(
            x, w, (1, 1), "VALID",
            dimension_numbers=("NCHW", "OIHW", "NCHW"), precision=hi)
        return jax.nn.relu(y + b[None, :, None, None])

    def pool(x):
        return jax.lax.reduce_window(x, -jnp.inf, jax.lax.max,
                                     (1, 1, 2, 2), (1, 1, 2, 2), "VALID")

    h = pool(conv(x, p["conv1_w"], p["conv1_b"]))
    h = pool(conv(h, p["conv2_w"], p["conv2_b"]))
    h = h.reshape(h.shape[0], -1)
    h = jax.nn.relu(jnp.dot(h, p["fc1_w"].T, precision=hi) + p["fc1_b"])
    h = jax.nn.relu(jnp.dot(h, p["fc2_w"].T, precision=hi) + p["fc2_b"])
    return jnp.dot(h, p["fc3_w"].T, precision=hi) + p["fc3_b"]


if __name__ == "__main__":
    B, in_channel, out_channel = 2, 3, 10
    key = jax.random.PRNGKey(0)
    k_params, k_x = jax.random.split(key)

    params = init_params(k_params, in_channel, out_channel)
    packed = pack_params(params)
    x = jax.random.normal(k_x, (B, in_channel, 32, 32), jnp.float32)

    fwd = jax.jit(functools.partial(net_forward, out_channel=out_channel))
    out = jax.block_until_ready(fwd(packed, x))
    assert out.shape == (B, out_channel), out.shape

    ref = jax.block_until_ready(jax.jit(reference_forward)(params, x))
    max_err = float(jnp.max(jnp.abs(out - ref)))
    # bf16 MXU operands vs f32 HIGHEST reference: expected max|diff| ~1e-2;
    # structural bugs would show up as O(0.1+) errors.
    assert max_err < 5e-2, f"mismatch vs XLA reference: max|diff|={max_err}"

    print("KERNEL_OK")
</pallas_src>

<mosaic_0001>
module attributes {stable_mosaic.version = 11 : i64} {
  func.func @_conv_pool_kernel(%arg0: i32, %arg1: memref<800x128xbf16, #tpu.memory_space<vmem>>, %arg2: memref<128x128xbf16, #tpu.memory_space<vmem>>, %arg3: memref<1x128xf32, #tpu.memory_space<vmem>>, %arg4: memref<200x128xbf16, #tpu.memory_space<vmem>>) attributes {dimension_semantics = [#tpu.dimension_semantics<parallel>], iteration_bounds = array<i64: 2>, scalar_prefetch = 0 : i64, scratch_operands = 0 : i64, tpu.core_type = #tpu.core_type<tc>, window_params = [{transform_indices = @transform_0, window_bounds = array<i64: 800, 128>}, {pipeline_mode = #tpu.pipeline_mode<synchronous>, transform_indices = @transform_1, window_bounds = array<i64: 128, 128>}, {pipeline_mode = #tpu.pipeline_mode<synchronous>, transform_indices = @transform_2, window_bounds = array<i64: 1, 128>}, {transform_indices = @transform_3, window_bounds = array<i64: 200, 128>}]} {
    %c0 = arith.constant 0 : index
    %c0_0 = arith.constant 0 : index
    %0 = vector.load %arg1[%c0, %c0_0] : memref<800x128xbf16, #tpu.memory_space<vmem>>, vector<800x128xbf16>
    %c0_1 = arith.constant 0 : index
    %c0_2 = arith.constant 0 : index
    %1 = vector.load %arg2[%c0_1, %c0_2] : memref<128x128xbf16, #tpu.memory_space<vmem>>, vector<128x128xbf16>
    %cst = arith.constant dense<0.000000e+00> : vector<800x128xf32>
    %2 = tpu.matmul %0, %1, %cst {dimension_numbers = #tpu.dot_dimension_numbers<[1], [0], [0], [1], [0, 0, 1, 1], [], []>} : vector<800x128xbf16>, vector<128x128xbf16>, vector<800x128xf32> -> vector<800x128xf32>
    %3 = vector.extract_strided_slice %2 {offsets = [0, 0], sizes = [200, 128], strides = [1, 1]} : vector<800x128xf32> to vector<200x128xf32>
    %4 = vector.extract_strided_slice %2 {offsets = [200, 0], sizes = [200, 128], strides = [1, 1]} : vector<800x128xf32> to vector<200x128xf32>
    %5 = arith.maximumf %3, %4 : vector<200x128xf32>
    %6 = vector.extract_strided_slice %2 {offsets = [400, 0], sizes = [200, 128], strides = [1, 1]} : vector<800x128xf32> to vector<200x128xf32>
    %7 = vector.extract_strided_slice %2 {offsets = [600, 0], sizes = [200, 128], strides = [1, 1]} : vector<800x128xf32> to vector<200x128xf32>
    %8 = arith.maximumf %6, %7 : vector<200x128xf32>
    %9 = arith.maximumf %5, %8 : vector<200x128xf32>
    %c0_3 = arith.constant 0 : index
    %c0_4 = arith.constant 0 : index
    %10 = vector.load %arg3[%c0_3, %c0_4] : memref<1x128xf32, #tpu.memory_space<vmem>>, vector<1x128xf32>
    %11 = vector.broadcast %10 : vector<1x128xf32> to vector<200x128xf32>
    %12 = arith.addf %9, %11 : vector<200x128xf32>
    %cst_5 = arith.constant 0.000000e+00 : f32
    %13 = vector.broadcast %cst_5 : f32 to vector<200x128xf32>
    %14 = arith.maximumf %12, %13 : vector<200x128xf32>
    %15 = arith.truncf %14 : vector<200x128xf32> to vector<200x128xbf16>
    %c0_6 = arith.constant 0 : index
    %c0_7 = arith.constant 0 : index
    %16 = vector.load %arg4[%c0_6, %c0_7] : memref<200x128xbf16, #tpu.memory_space<vmem>>, vector<200x128xbf16>
    tpu.vector_store %arg4[%c0_6, %c0_7], %15 {strides = array<i32>} : memref<200x128xbf16, #tpu.memory_space<vmem>>, vector<200x128xbf16>,
    return
  }
  func.func @transform_0(%arg0: i32) -> (i32, i32) {
    %c0_i32 = arith.constant 0 : i32
    %c0_i32_0 = arith.constant 0 : i32
    return %arg0, %c0_i32 : i32, i32
  }
  func.func @transform_1(%arg0: i32) -> (i32, i32) {
    %c0_i32 = arith.constant 0 : i32
    %c0_i32_0 = arith.constant 0 : i32
    %c0_i32_1 = arith.constant 0 : i32
    return %c0_i32, %c0_i32_0 : i32, i32
  }
  func.func @transform_2(%arg0: i32) -> (i32, i32) {
    %c0_i32 = arith.constant 0 : i32
    %c0_i32_0 = arith.constant 0 : i32
    %c0_i32_1 = arith.constant 0 : i32
    return %c0_i32, %c0_i32_0 : i32, i32
  }
  func.func @transform_3(%arg0: i32) -> (i32, i32) {
    %c0_i32 = arith.constant 0 : i32
    %c0_i32_0 = arith.constant 0 : i32
    return %arg0, %c0_i32 : i32, i32
  }
}

module attributes {stable_mosaic.version = 11 : i64} {
  func.func @_conv_pool_kernel(%arg0: i32, %arg1: memref<224x256xbf16, #tpu.memory_space<vmem>>, %arg2: memref<256x128xbf16, #tpu.memory_space<vmem>>, %arg3: memref<1x128xf32, #tpu.memory_space<vmem>>, %arg4: memref<56x128xbf16, #tpu.memory_space<vmem>>) attributes {dimension_semantics = [#tpu.dimension_semantics<parallel>], iteration_bounds = array<i64: 1>, scalar_prefetch = 0 : i64, scratch_operands = 0 : i64, tpu.core_type = #tpu.core_type<tc>, window_params = [{transform_indices = @transform_0, window_bounds = array<i64: 224, 256>}, {pipeline_mode = #tpu.pipeline_mode<synchronous>, transform_indices = @transform_1, window_bounds = array<i64: 256, 128>}, {pipeline_mode = #tpu.pipeline_mode<synchronous>, transform_indices = @transform_2, window_bounds = array<i64: 1, 128>}, {transform_indices = @transform_3, window_bounds = array<i64: 56, 128>}]} {
    %c0 = arith.constant 0 : index
    %c0_0 = arith.constant 0 : index
    %0 = vector.load %arg1[%c0, %c0_0] : memref<224x256xbf16, #tpu.memory_space<vmem>>, vector<224x256xbf16>
    %c0_1 = arith.constant 0 : index
    %c0_2 = arith.constant 0 : index
    %1 = vector.load %arg2[%c0_1, %c0_2] : memref<256x128xbf16, #tpu.memory_space<vmem>>, vector<256x128xbf16>
    %cst = arith.constant dense<0.000000e+00> : vector<224x128xf32>
    %2 = tpu.matmul %0, %1, %cst {dimension_numbers = #tpu.dot_dimension_numbers<[1], [0], [0], [1], [0, 0, 1, 1], [], []>} : vector<224x256xbf16>, vector<256x128xbf16>, vector<224x128xf32> -> vector<224x128xf32>
    %3 = vector.extract_strided_slice %2 {offsets = [0, 0], sizes = [56, 128], strides = [1, 1]} : vector<224x128xf32> to vector<56x128xf32>
    %4 = vector.extract_strided_slice %2 {offsets = [56, 0], sizes = [56, 128], strides = [1, 1]} : vector<224x128xf32> to vector<56x128xf32>
    %5 = arith.maximumf %3, %4 : vector<56x128xf32>
    %6 = vector.extract_strided_slice %2 {offsets = [112, 0], sizes = [56, 128], strides = [1, 1]} : vector<224x128xf32> to vector<56x128xf32>
    %7 = vector.extract_strided_slice %2 {offsets = [168, 0], sizes = [56, 128], strides = [1, 1]} : vector<224x128xf32> to vector<56x128xf32>
    %8 = arith.maximumf %6, %7 : vector<56x128xf32>
    %9 = arith.maximumf %5, %8 : vector<56x128xf32>
    %c0_3 = arith.constant 0 : index
    %c0_4 = arith.constant 0 : index
    %10 = vector.load %arg3[%c0_3, %c0_4] : memref<1x128xf32, #tpu.memory_space<vmem>>, vector<1x128xf32>
    %11 = vector.broadcast %10 : vector<1x128xf32> to vector<56x128xf32>
    %12 = arith.addf %9, %11 : vector<56x128xf32>
    %cst_5 = arith.constant 0.000000e+00 : f32
    %13 = vector.broadcast %cst_5 : f32 to vector<56x128xf32>
    %14 = arith.maximumf %12, %13 : vector<56x128xf32>
    %15 = arith.truncf %14 : vector<56x128xf32> to vector<56x128xbf16>
    %c0_6 = arith.constant 0 : index
    %c0_7 = arith.constant 0 : index
    %16 = vector.load %arg4[%c0_6, %c0_7] : memref<56x128xbf16, #tpu.memory_space<vmem>>, vector<56x128xbf16>
    tpu.vector_store %arg4[%c0_6, %c0_7], %15 {strides = array<i32>} : memref<56x128xbf16, #tpu.memory_space<vmem>>, vector<56x128xbf16>,
    return
  }
  func.func @transform_0(%arg0: i32) -> (i32, i32) {
    %c0_i32 = arith.constant 0 : i32
    %c0_i32_0 = arith.constant 0 : i32
    return %arg0, %c0_i32 : i32, i32
  }
  func.func @transform_1(%arg0: i32) -> (i32, i32) {
    %c0_i32 = arith.constant 0 : i32
    %c0_i32_0 = arith.constant 0 : i32
    %c0_i32_1 = arith.constant 0 : i32
    return %c0_i32, %c0_i32_0 : i32, i32
  }
  func.func @transform_2(%arg0: i32) -> (i32, i32) {
    %c0_i32 = arith.constant 0 : i32
    %c0_i32_0 = arith.constant 0 : i32
    %c0_i32_1 = arith.constant 0 : i32
    return %c0_i32, %c0_i32_0 : i32, i32
  }
  func.func @transform_3(%arg0: i32) -> (i32, i32) {
    %c0_i32 = arith.constant 0 : i32
    %c0_i32_0 = arith.constant 0 : i32
    return %arg0, %c0_i32 : i32, i32
  }
}

module attributes {stable_mosaic.version = 11 : i64} {
  func.func @_fc_fused_kernel(%arg0: i32, %arg1: memref<8x512xbf16, #tpu.memory_space<vmem>>, %arg2: memref<512x128xbf16, #tpu.memory_space<vmem>>, %arg3: memref<1x128xf32, #tpu.memory_space<vmem>>, %arg4: memref<128x128xbf16, #tpu.memory_space<vmem>>, %arg5: memref<1x128xf32, #tpu.memory_space<vmem>>, %arg6: memref<128x128xbf16, #tpu.memory_space<vmem>>, %arg7: memref<1x128xf32, #tpu.memory_space<vmem>>, %arg8: memref<8x128xf32, #tpu.memory_space<vmem>>) attributes {dimension_semantics = [#tpu.dimension_semantics<parallel>], iteration_bounds = array<i64: 1>, scalar_prefetch = 0 : i64, scratch_operands = 0 : i64, tpu.core_type = #tpu.core_type<tc>, window_params = [{transform_indices = @transform_0, window_bounds = array<i64: 8, 512>}, {pipeline_mode = #tpu.pipeline_mode<synchronous>, transform_indices = @transform_1, window_bounds = array<i64: 512, 128>}, {pipeline_mode = #tpu.pipeline_mode<synchronous>, transform_indices = @transform_2, window_bounds = array<i64: 1, 128>}, {pipeline_mode = #tpu.pipeline_mode<synchronous>, transform_indices = @transform_3, window_bounds = array<i64: 128, 128>}, {pipeline_mode = #tpu.pipeline_mode<synchronous>, transform_indices = @transform_4, window_bounds = array<i64: 1, 128>}, {pipeline_mode = #tpu.pipeline_mode<synchronous>, transform_indices = @transform_5, window_bounds = array<i64: 128, 128>}, {pipeline_mode = #tpu.pipeline_mode<synchronous>, transform_indices = @transform_6, window_bounds = array<i64: 1, 128>}, {transform_indices = @transform_7, window_bounds = array<i64: 8, 128>}]} {
    %c0 = arith.constant 0 : index
    %c0_0 = arith.constant 0 : index
    %0 = vector.load %arg1[%c0, %c0_0] : memref<8x512xbf16, #tpu.memory_space<vmem>>, vector<8x512xbf16>
    %c0_1 = arith.constant 0 : index
    %c0_2 = arith.constant 0 : index
    %1 = vector.load %arg2[%c0_1, %c0_2] : memref<512x128xbf16, #tpu.memory_space<vmem>>, vector<512x128xbf16>
    %cst = arith.constant dense<0.000000e+00> : vector<8x128xf32>
    %2 = tpu.matmul %0, %1, %cst {dimension_numbers = #tpu.dot_dimension_numbers<[1], [0], [0], [1], [0, 0, 1, 1], [], []>} : vector<8x512xbf16>, vector<512x128xbf16>, vector<8x128xf32> -> vector<8x128xf32>
    %c0_3 = arith.constant 0 : index
    %c0_4 = arith.constant 0 : index
    %3 = vector.load %arg3[%c0_3, %c0_4] : memref<1x128xf32, #tpu.memory_space<vmem>>, vector<1x128xf32>
    %4 = vector.broadcast %3 : vector<1x128xf32> to vector<8x128xf32>
    %5 = arith.addf %2, %4 : vector<8x128xf32>
    %cst_5 = arith.constant 0.000000e+00 : f32
    %6 = vector.broadcast %cst_5 : f32 to vector<8x128xf32>
    %7 = arith.maximumf %5, %6 : vector<8x128xf32>
    %8 = arith.truncf %7 : vector<8x128xf32> to vector<8x128xbf16>
    %c0_6 = arith.constant 0 : index
    %c0_7 = arith.constant 0 : index
    %9 = vector.load %arg4[%c0_6, %c0_7] : memref<128x128xbf16, #tpu.memory_space<vmem>>, vector<128x128xbf16>
    %cst_8 = arith.constant dense<0.000000e+00> : vector<8x128xf32>
    %10 = tpu.matmul %8, %9, %cst_8 {dimension_numbers = #tpu.dot_dimension_numbers<[1], [0], [0], [1], [0, 0, 1, 1], [], []>} : vector<8x128xbf16>, vector<128x128xbf16>, vector<8x128xf32> -> vector<8x128xf32>
    %c0_9 = arith.constant 0 : index
    %c0_10 = arith.constant 0 : index
    %11 = vector.load %arg5[%c0_9, %c0_10] : memref<1x128xf32, #tpu.memory_space<vmem>>, vector<1x128xf32>
    %12 = vector.broadcast %11 : vector<1x128xf32> to vector<8x128xf32>
    %13 = arith.addf %10, %12 : vector<8x128xf32>
    %cst_11 = arith.constant 0.000000e+00 : f32
    %14 = vector.broadcast %cst_11 : f32 to vector<8x128xf32>
    %15 = arith.maximumf %13, %14 : vector<8x128xf32>
    %16 = arith.truncf %15 : vector<8x128xf32> to vector<8x128xbf16>
    %c0_12 = arith.constant 0 : index
    %c0_13 = arith.constant 0 : index
    %17 = vector.load %arg6[%c0_12, %c0_13] : memref<128x128xbf16, #tpu.memory_space<vmem>>, vector<128x128xbf16>
    %cst_14 = arith.constant dense<0.000000e+00> : vector<8x128xf32>
    %18 = tpu.matmul %16, %17, %cst_14 {dimension_numbers = #tpu.dot_dimension_numbers<[1], [0], [0], [1], [0, 0, 1, 1], [], []>} : vector<8x128xbf16>, vector<128x128xbf16>, vector<8x128xf32> -> vector<8x128xf32>
    %c0_15 = arith.constant 0 : index
    %c0_16 = arith.constant 0 : index
    %19 = vector.load %arg7[%c0_15, %c0_16] : memref<1x128xf32, #tpu.memory_space<vmem>>, vector<1x128xf32>
    %20 = vector.broadcast %19 : vector<1x128xf32> to vector<8x128xf32>
    %21 = arith.addf %18, %20 : vector<8x128xf32>
    %c0_17 = arith.constant 0 : index
    %c0_18 = arith.constant 0 : index
    %22 = vector.load %arg8[%c0_17, %c0_18] : memref<8x128xf32, #tpu.memory_space<vmem>>, vector<8x128xf32>
    tpu.vector_store %arg8[%c0_17, %c0_18], %21 {strides = array<i32>} : memref<8x128xf32, #tpu.memory_space<vmem>>, vector<8x128xf32>,
    return
  }
  func.func @transform_0(%arg0: i32) -> (i32, i32) {
    %c0_i32 = arith.constant 0 : i32
    %c0_i32_0 = arith.constant 0 : i32
    return %arg0, %c0_i32 : i32, i32
  }
  func.func @transform_1(%arg0: i32) -> (i32, i32) {
    %c0_i32 = arith.constant 0 : i32
    %c0_i32_0 = arith.constant 0 : i32
    %c0_i32_1 = arith.constant 0 : i32
    return %c0_i32, %c0_i32_0 : i32, i32
  }
  func.func @transform_2(%arg0: i32) -> (i32, i32) {
    %c0_i32 = arith.constant 0 : i32
    %c0_i32_0 = arith.constant 0 : i32
    %c0_i32_1 = arith.constant 0 : i32
    return %c0_i32, %c0_i32_0 : i32, i32
  }
  func.func @transform_3(%arg0: i32) -> (i32, i32) {
    %c0_i32 = arith.constant 0 : i32
    %c0_i32_0 = arith.constant 0 : i32
    %c0_i32_1 = arith.constant 0 : i32
    return %c0_i32, %c0_i32_0 : i32, i32
  }
  func.func @transform_4(%arg0: i32) -> (i32, i32) {
    %c0_i32 = arith.constant 0 : i32
    %c0_i32_0 = arith.constant 0 : i32
    %c0_i32_1 = arith.constant 0 : i32
    return %c0_i32, %c0_i32_0 : i32, i32
  }
  func.func @transform_5(%arg0: i32) -> (i32, i32) {
    %c0_i32 = arith.constant 0 : i32
    %c0_i32_0 = arith.constant 0 : i32
    %c0_i32_1 = arith.constant 0 : i32
    return %c0_i32, %c0_i32_0 : i32, i32
  }
  func.func @transform_6(%arg0: i32) -> (i32, i32) {
    %c0_i32 = arith.constant 0 : i32
    %c0_i32_0 = arith.constant 0 : i32
    %c0_i32_1 = arith.constant 0 : i32
    return %c0_i32, %c0_i32_0 : i32, i32
  }
  func.func @transform_7(%arg0: i32) -> (i32, i32) {
    %c0_i32 = arith.constant 0 : i32
    %c0_i32_0 = arith.constant 0 : i32
    return %arg0, %c0_i32 : i32, i32
  }
}

</mosaic_0001>

<bundles_post_ra>
// kernel: net_forward.3
= control target key start
LH: loop header
LB: loop body
LE: loop exit
PB: predicated region body
PF: predicated region fallthrough
CT: control target
= control target key end

     0   :  { %s1563_s12 = smov 0   ;;  %s1720_s0 = inlined_call_operand.vmem [shape: bf16[1600,128], index: 0, kind: input, shape index: {}]   ;;  %s1721_s1 = inlined_call_operand.vmem [shape: bf16[128,128], index: 1, kind: input, shape index: {}]   ;;  %s1722_s2 = inlined_call_operand.vmem [shape: f32[1,128], index: 2, kind: input, shape index: {}]   ;;  %s1723_s3 = inlined_call_operand.vmem [shape: bf16[400,128], index: 3, kind: output, shape index: {}]  }
   0x1 LB: > { %s1132_s13 = sadd.s32 4294967295, %s1541_s12   ;;  %p1136_p0 = scmp.ge.s32.totalorder %s1541_s12, 1  ;;  %s1541_s12 = sphi %s1563_s12, %s13_s12  }
   0x2   : > { %p138_p1 = scmp.lt.s32.totalorder %s1541_s12, 3 }
   0x4   : > { %p139_p2 = pnand %p1136_p0, %p138_p1 }
   0x5   : > { %s162_s22 = smul.u32 (!%p139_p2), 100, %s1132_s13 }
   0x6   : > { %142 = sbr.rel (%p139_p2) target bundleno = 387 (0x183), region = 32 }
   0x7   : > { %p163_p3 = scmp.lt.s32.totalorder (!%p139_p2), %s162_s22, 199  ;;  %s168_s8 = smul.u32 (!%p139_p2), 25, %s1132_s13 }
   0x9   : > { %p169_p4 = scmp.lt.s32.totalorder (!%p139_p2), %s168_s8, 49 }
   0xb   : > { %v1430_v0 = vld [vmem:[%s1721_s1 + $0x38] sm:$0xff]  ;;  %v1429_v1 = vld [vmem:[%s1721_s1 + $0x30] sm:$0xff]  ;;  %v1428_v2 = vld [vmem:[%s1721_s1 + $0x28] sm:$0xff]  ;;  %s1725_s22 = smov (!%p163_p3, %s162_s22), 199  ;;  %s1727_s8 = smov (!%p169_p4, %s168_s8), 49 }
   0xc   : > { %638 = vmatpush.bf16.msra.mxu0 %v1430_v0  ;;  %1503 = vmatpush.bf16.msra.mxu2 %v1430_v0  ;;  %v1427_v3 = vld [vmem:[%s1721_s1 + $0x20] sm:$0xff]  ;;  %v1426_v4 = vld [vmem:[%s1721_s1 + $0x18] sm:$0xff]  ;;  %v1425_v5 = vld [vmem:[%s1721_s1 + $0x10] sm:$0xff]  ;;  %s1137_s29 = sshll.u32 %s1725_s22, 2  ;;  %s1138_s11 = sshll.u32 %s1727_s8, 2 }
   0xd   : > { %1504 = vmatpush.bf16.msra.mxu3 %v1430_v0  ;;  %1502 = vmatpush.bf16.msra.mxu1 %v1430_v0  ;;  %v1424_v6 = vld [vmem:[%s1721_s1 + $0x8] sm:$0xff]  ;;  %v1423_v7 = vld [vmem:[%s1721_s1] sm:$0xff]  ;;  %s1600_s7 = scalar_lea.vmem %s1720_s0, %s1137_s29  ;;  %s1668_s15 = scalar_lea.vmem %s1723_s3, %s1138_s11 }
   0xe   : > { %v1373_v8 = vld [vmem:[%s1600_s7] sm:$0xff]  ;;  %v1410_v10 = vld [vmem:[%s1600_s7 + $0x128] sm:$0xff]  ;;  %v1411_v14 = vld [vmem:[%s1600_s7 + $0x130] sm:$0xff] }
   0xf   : > { %v1397_v9 = vld [vmem:[%s1600_s7 + $0xc0] sm:$0xff]  ;;  %v1374_v12 = vld [vmem:[%s1600_s7 + $0x8] sm:$0xff]  ;;  %v1375_v16 = vld [vmem:[%s1600_s7 + $0x10] sm:$0xff] }
  0x10   : > { %639 = vmatpush.bf16.msra.mxu0 %v1429_v1  ;;  %1506 = vmatpush.bf16.msra.mxu2 %v1429_v1  ;;  %v1385_v11 = vld [vmem:[%s1600_s7 + $0x60] sm:$0xff]  ;;  %v1398_v13 = vld [vmem:[%s1600_s7 + $0xc8] sm:$0xff]  ;;  %v1399_v17 = vld [vmem:[%s1600_s7 + $0xd0] sm:$0xff] }
  0x11   : > { %1507 = vmatpush.bf16.msra.mxu3 %v1429_v1  ;;  %1505 = vmatpush.bf16.msra.mxu1 %v1429_v1  ;;  %v1386_v15 = vld [vmem:[%s1600_s7 + $0x68] sm:$0xff]  ;;  %v1412_v18 = vld [vmem:[%s1600_s7 + $0x138] sm:$0xff]  ;;  %v1387_v19 = vld [vmem:[%s1600_s7 + $0x70] sm:$0xff] }
  0x12   : > { %v1376_v20 = vld [vmem:[%s1600_s7 + $0x18] sm:$0xff]  ;;  %v1413_v22 = vld [vmem:[%s1600_s7 + $0x140] sm:$0xff]  ;;  %v1414_v26 = vld [vmem:[%s1600_s7 + $0x148] sm:$0xff] }
  0x13   : > { %v1400_v21 = vld [vmem:[%s1600_s7 + $0xd8] sm:$0xff]  ;;  %v1377_v24 = vld [vmem:[%s1600_s7 + $0x20] sm:$0xff]  ;;  %v1378_v28 = vld [vmem:[%s1600_s7 + $0x28] sm:$0xff] }
  0x14   : > { %640 = vmatpush.bf16.msra.mxu0 %v1428_v2  ;;  %1509 = vmatpush.bf16.msra.mxu2 %v1428_v2  ;;  %v1388_v23 = vld [vmem:[%s1600_s7 + $0x78] sm:$0xff]  ;;  %v1401_v25 = vld [vmem:[%s1600_s7 + $0xe0] sm:$0xff]  ;;  %v1402_v29 = vld [vmem:[%s1600_s7 + $0xe8] sm:$0xff] }
  0x15   : > { %1510 = vmatpush.bf16.msra.mxu3 %v1428_v2  ;;  %1508 = vmatpush.bf16.msra.mxu1 %v1428_v2  ;;  %v1389_v27 = vld [vmem:[%s1600_s7 + $0x80] sm:$0xff]  ;;  %v1415_v30 = vld [vmem:[%s1600_s7 + $0x150] sm:$0xff]  ;;  %v1390_v31 = vld [vmem:[%s1600_s7 + $0x88] sm:$0xff] }
  0x16   : > { %v1379_v32 = vld [vmem:[%s1600_s7 + $0x30] sm:$0xff]  ;;  %v1416_v34 = vld [vmem:[%s1600_s7 + $0x158] sm:$0xff]  ;;  %v1417_v38 = vld [vmem:[%s1600_s7 + $0x160] sm:$0xff] }
  0x17   : > { %v1403_v33 = vld [vmem:[%s1600_s7 + $0xf0] sm:$0xff]  ;;  %v1380_v36 = vld [vmem:[%s1600_s7 + $0x38] sm:$0xff]  ;;  %v1381_v40 = vld [vmem:[%s1600_s7 + $0x40] sm:$0xff] }
  0x18   : > { %641 = vmatpush.bf16.msra.mxu0 %v1427_v3  ;;  %1512 = vmatpush.bf16.msra.mxu2 %v1427_v3  ;;  %v1391_v35 = vld [vmem:[%s1600_s7 + $0x90] sm:$0xff]  ;;  %v1404_v37 = vld [vmem:[%s1600_s7 + $0xf8] sm:$0xff]  ;;  %v1405_v41 = vld [vmem:[%s1600_s7 + $0x100] sm:$0xff] }
  0x19   : > { %1513 = vmatpush.bf16.msra.mxu3 %v1427_v3  ;;  %1511 = vmatpush.bf16.msra.mxu1 %v1427_v3  ;;  %v1392_v39 = vld [vmem:[%s1600_s7 + $0x98] sm:$0xff]  ;;  %v1418_v43 = vld [vmem:[%s1600_s7 + $0x168] sm:$0xff]  ;;  %v1393_v44 = vld [vmem:[%s1600_s7 + $0xa0] sm:$0xff] }
  0x1a   : > { %v1382_v53 = vld [vmem:[%s1600_s7 + $0x48] sm:$0xff]  ;;  %v1419_v56 = vld [vmem:[%s1600_s7 + $0x170] sm:$0xff]  ;;  %v1657_v2 = vld [vmem:[%s1722_s2] ss:$0 sm:$0xff] }
  0x1b   : > { %v1406_v54 = vld [vmem:[%s1600_s7 + $0x108] sm:$0xff] }
  0x1c   : > { %642 = vmatpush.bf16.msra.mxu0 %v1426_v4  ;;  %1515 = vmatpush.bf16.msra.mxu2 %v1426_v4  ;;  %v1394_v57 = vld [vmem:[%s1600_s7 + $0xa8] sm:$0xff] }
  0x1d   : > { %1516 = vmatpush.bf16.msra.mxu3 %v1426_v4  ;;  %1514 = vmatpush.bf16.msra.mxu1 %v1426_v4 }
  0x20   : > { %643 = vmatpush.bf16.msra.mxu0 %v1425_v5  ;;  %1518 = vmatpush.bf16.msra.mxu2 %v1425_v5 }
  0x21   : > { %1519 = vmatpush.bf16.msra.mxu3 %v1425_v5  ;;  %1517 = vmatpush.bf16.msra.mxu1 %v1425_v5 }
  0x24   : > { %644 = vmatpush.bf16.msra.mxu0 %v1424_v6  ;;  %1521 = vmatpush.bf16.msra.mxu2 %v1424_v6 }
  0x25   : > { %1522 = vmatpush.bf16.msra.mxu3 %v1424_v6  ;;  %1520 = vmatpush.bf16.msra.mxu1 %v1424_v6 }
  0x28   : > { %645 = vmatpush.bf16.msra.mxu0 %v1423_v7  ;;  %1524 = vmatpush.bf16.msra.mxu2 %v1423_v7 }
  0x29   : > { %1525 = vmatpush.bf16.msra.mxu3 %v1423_v7  ;;  %1523 = vmatpush.bf16.msra.mxu1 %v1423_v7  ;;  %v1383_v7 = vld [vmem:[%s1600_s7 + $0x50] sm:$0xff] }
  0x2b   : > { %646 = vmatmul.bf16.vlgmr.msra.gmra.mxu0 %v1373_v8  ;;  %766 = vmatmul.bf16.vlgmr.msra.gmra.mxu2 %v1397_v9  ;;  %v1407_v8 = vld [vmem:[%s1600_s7 + $0x110] sm:$0xff] }
  0x2c   : > { %831 = vmatmul.bf16.vlgmr.msra.gmra.mxu3 %v1410_v10  ;;  %706 = vmatmul.bf16.vlgmr.msra.gmra.mxu1 %v1385_v11  ;;  %v1420_v10 = vld [vmem:[%s1600_s7 + $0x178] sm:$0xff]  ;;  %v1395_v11 = vld [vmem:[%s1600_s7 + $0xb0] sm:$0xff] }
  0x3b   : > { %651 = vmatmul.bf16.gmra.mxu0 %v1374_v12  ;;  %771 = vmatmul.bf16.gmra.mxu2 %v1398_v13 }
  0x3c   : > { %836 = vmatmul.bf16.gmra.mxu3 %v1411_v14  ;;  %711 = vmatmul.bf16.gmra.mxu1 %v1386_v15 }
  0x4b   : > { %656 = vmatmul.bf16.gmra.mxu0 %v1375_v16  ;;  %776 = vmatmul.bf16.gmra.mxu2 %v1399_v17 }
  0x4c   : > { %841 = vmatmul.bf16.gmra.mxu3 %v1412_v18  ;;  %716 = vmatmul.bf16.gmra.mxu1 %v1387_v19 }
  0x5b   : > { %661 = vmatmul.bf16.gmra.mxu0 %v1376_v20  ;;  %781 = vmatmul.bf16.gmra.mxu2 %v1400_v21 }
  0x5c   : > { %846 = vmatmul.bf16.gmra.mxu3 %v1413_v22  ;;  %721 = vmatmul.bf16.gmra.mxu1 %v1388_v23 }
  0x6b   : > { %666 = vmatmul.bf16.gmra.mxu0 %v1377_v24  ;;  %786 = vmatmul.bf16.gmra.mxu2 %v1401_v25 }
  0x6c   : > { %851 = vmatmul.bf16.gmra.mxu3 %v1414_v26  ;;  %726 = vmatmul.bf16.gmra.mxu1 %v1389_v27 }
  0x7b   : > { %671 = vmatmul.bf16.gmra.mxu0 %v1378_v28  ;;  %791 = vmatmul.bf16.gmra.mxu2 %v1402_v29 }
  0x7c   : > { %856 = vmatmul.bf16.gmra.mxu3 %v1415_v30  ;;  %731 = vmatmul.bf16.gmra.mxu1 %v1390_v31  ;;  %v1384_v30 = vld [vmem:[%s1600_s7 + $0x58] sm:$0xff] }
  0x7d   : > { %v1408_v31 = vld [vmem:[%s1600_s7 + $0x118] sm:$0xff] }
  0x8b   : > { %676 = vmatmul.bf16.gmra.mxu0 %v1379_v32  ;;  %796 = vmatmul.bf16.gmra.mxu2 %v1403_v33  ;;  %v1421_v33 = vld [vmem:[%s1600_s7 + $0x180] sm:$0xff] }
  0x8c   : > { %861 = vmatmul.bf16.gmra.mxu3 %v1416_v34  ;;  %736 = vmatmul.bf16.gmra.mxu1 %v1391_v35  ;;  %v1396_v34 = vld [vmem:[%s1600_s7 + $0xb8] sm:$0xff] }
  0x9b   : > { %681 = vmatmul.bf16.gmra.mxu0 %v1380_v36  ;;  %801 = vmatmul.bf16.gmra.mxu2 %v1404_v37 }
  0x9c   : > { %866 = vmatmul.bf16.gmra.mxu3 %v1417_v38  ;;  %741 = vmatmul.bf16.gmra.mxu1 %v1392_v39 }
  0xa8   : > { %v647_v42 = vpop.f32.mrf.mxu0 }
  0xa9   : > { %v1638_v45 = vpop.f32.mrf.mxu1 }
  0xab   : > { %686 = vmatmul.bf16.gmra.mxu0 %v1381_v40  ;;  %806 = vmatmul.bf16.gmra.mxu2 %v1405_v41 }
  0xac   : > { %871 = vmatmul.bf16.gmra.mxu3 %v1418_v43  ;;  %746 = vmatmul.bf16.gmra.mxu1 %v1393_v44 }
  0xae   : > { %v1640_v46 = vpop.f32.mrf.mxu2 }
  0xaf   : > { %v1642_v47 = vpop.f32.mrf.mxu3 }
  0xb0   : > { %v649_v48 = vpop.f32.mrf.mxu0 }
  0xb1   : > { %v709_v49 = vpop.f32.mrf.mxu1 }
  0xb2   : > { %v897_v62 = vmax.f32 %v647_v42, %v709_v49 }
  0xb6   : > { %v1644_v50 = vpop.f32.mrf.mxu2 }
  0xb7   : > { %v921_v51 = vmax.f32 %v1638_v45, %v1644_v50  ;;  %v834_v52 = vpop.f32.mrf.mxu3 }
  0xb8   : > { %v652_v55 = vpop.f32.mrf.mxu0 }
  0xb9   : > { %v712_v58 = vpop.f32.mrf.mxu1 }
  0xba   : > { %v898_v4 = vmax.f32 %v649_v48, %v712_v58  ;;  %v1409_v58 = vld [vmem:[%s1600_s7 + $0x120] sm:$0xff] }
  0xbb   : > { %691 = vmatmul.bf16.gmra.mxu0 %v1382_v53  ;;  %811 = vmatmul.bf16.gmra.mxu2 %v1406_v54 }
  0xbc   : > { %876 = vmatmul.bf16.gmra.mxu3 %v1419_v56  ;;  %751 = vmatmul.bf16.gmra.mxu1 %v1394_v57 }
  0xbe   : > { %v772_v59 = vpop.f32.mrf.mxu2 }
  0xbf   : > { %v837_v60 = vpop.f32.mrf.mxu3  ;;  %v922_v63 = vmax.f32 %v772_v59, %v834_v52 }
  0xc0   : > { %v654_v61 = vpop.f32.mrf.mxu0 }
  0xc1   : > { %v714_v0 = vpop.f32.mrf.mxu1  ;;  %v947_v1 = vmax.f32 %v897_v62, %v922_v63 }
  0xc2   : > { %v899_v22 = vmax.f32 %v652_v55, %v714_v0 }
  0xc3   : > { %v976_v12 = vadd.f32 %v1657_v2, %v947_v1 }
  0xc5   : > { %v1001_v16 = vmax.f32 %v976_v12, 0.0 }
  0xc6   : > { %v774_v3 = vpop.f32.mrf.mxu2 }
  0xc7   : > { %v923_v5 = vmax.f32 %v774_v3, %v837_v60  ;;  %v839_v6 = vpop.f32.mrf.mxu3  ;;  %v1422_v60 = vld [vmem:[%s1600_s7 + $0x188] sm:$0xff] }
  0xc8   : > { %v657_v9 = vpop.f32.mrf.mxu0 }
  0xc9   : > { %v948_v13 = vmax.f32 %v898_v4, %v923_v5  ;;  %v717_v14 = vpop.f32.mrf.mxu1 }
  0xca   : > { %v900_v27 = vmax.f32 %v654_v61, %v717_v14 }
  0xcb   : > { %v977_v15 = vadd.f32 %v1657_v2, %v948_v13  ;;  %696 = vmatmul.bf16.gmra.mxu0 %v1383_v7  ;;  %816 = vmatmul.bf16.gmra.mxu2 %v1407_v8 }
  0xcc   : > { %881 = vmatmul.bf16.gmra.mxu3 %v1420_v10  ;;  %756 = vmatmul.bf16.gmra.mxu1 %v1395_v11 }
  0xcd   : > { %v1002_v17 = vmax.f32 %v977_v15, 0.0 }
  0xce   : > { %v777_v18 = vpop.f32.mrf.mxu2 }
  0xcf   : > { %v1434_v19 = vpack.c.bf16 %v1002_v17, %v1001_v16  ;;  %v842_v20 = vpop.f32.mrf.mxu3  ;;  %v924_v23 = vmax.f32 %v777_v18, %v839_v6 }
  0xd0   : > { %v659_v21 = vpop.f32.mrf.mxu0 }
  0xd1   : > { %1435 = vst [vmem:[%s1668_s15] sm:$0xff] %v1434_v19   ;;  %v719_v24 = vpop.f32.mrf.mxu1  ;;  %v949_v25 = vmax.f32 %v899_v22, %v924_v23 }
  0xd2   : > { %v901_v48 = vmax.f32 %v657_v9, %v719_v24 }
  0xd3   : > { %v978_v35 = vadd.f32 %v1657_v2, %v949_v25 }
  0xd5   : > { %v1003_v39 = vmax.f32 %v978_v35, 0.0 }
  0xd6   : > { %v779_v26 = vpop.f32.mrf.mxu2 }
  0xd7   : > { %v925_v28 = vmax.f32 %v779_v26, %v842_v20  ;;  %v844_v29 = vpop.f32.mrf.mxu3 }
  0xd8   : > { %v662_v32 = vpop.f32.mrf.mxu0 }
  0xd9   : > { %v950_v36 = vmax.f32 %v900_v27, %v925_v28  ;;  %v722_v37 = vpop.f32.mrf.mxu1 }
  0xda   : > { %v902_v55 = vmax.f32 %v659_v21, %v722_v37 }
  0xdb   : > { %v979_v38 = vadd.f32 %v1657_v2, %v950_v36  ;;  %701 = vmatmul.bf16.gmra.mxu0 %v1384_v30  ;;  %821 = vmatmul.bf16.gmra.mxu2 %v1408_v31 }
  0xdc   : > { %886 = vmatmul.bf16.gmra.mxu3 %v1421_v33  ;;  %761 = vmatmul.bf16.gmra.mxu1 %v1396_v34 }
  0xdd   : > { %v1004_v40 = vmax.f32 %v979_v38, 0.0 }
  0xde   : > { %v782_v41 = vpop.f32.mrf.mxu2 }
  0xdf   : > { %v1439_v42 = vpack.c.bf16 %v1004_v40, %v1003_v39  ;;  %v847_v43 = vpop.f32.mrf.mxu3  ;;  %v926_v49 = vmax.f32 %v782_v41, %v844_v29 }
  0xe0   : > { %v664_v44 = vpop.f32.mrf.mxu0 }
  0xe1   : > { %1491 = vst [vmem:[%s1668_s15 + $0x8] sm:$0xff] %v1439_v42   ;;  %v724_v52 = vpop.f32.mrf.mxu1  ;;  %v951_v53 = vmax.f32 %v901_v48, %v926_v49 }
  0xe2   : > { %v903_v8 = vmax.f32 %v662_v32, %v724_v52 }
  0xe3   : > { %v980_v61 = vadd.f32 %v1657_v2, %v951_v53 }
  0xe5   : > { %v1005_v1 = vmax.f32 %v980_v61, 0.0 }
  0xe6   : > { %v784_v54 = vpop.f32.mrf.mxu2 }
  0xe7   : > { %v927_v56 = vmax.f32 %v784_v54, %v847_v43  ;;  %v849_v57 = vpop.f32.mrf.mxu3 }
  0xe8   : > { %v667_v59 = vpop.f32.mrf.mxu0 }
  0xe9   : > { %v952_v62 = vmax.f32 %v902_v55, %v927_v56  ;;  %v727_v63 = vpop.f32.mrf.mxu1 }
  0xea   : > { %v904_v13 = vmax.f32 %v664_v44, %v727_v63 }
  0xeb   : > { %v981_v0 = vadd.f32 %v1657_v2, %v952_v62  ;;  %826 = vmatmul.bf16.gmra.mxu2 %v1409_v58 }
  0xec   : > { %891 = vmatmul.bf16.gmra.mxu3 %v1422_v60 }
  0xed   : > { %v1006_v3 = vmax.f32 %v981_v0, 0.0 }
  0xee   : > { %v787_v4 = vpop.f32.mrf.mxu2 }
  0xef   : > { %v1444_v5 = vpack.c.bf16 %v1006_v3, %v1005_v1  ;;  %v852_v6 = vpop.f32.mrf.mxu3  ;;  %v928_v9 = vmax.f32 %v787_v4, %v849_v57 }
  0xf0   : > { %v669_v7 = vpop.f32.mrf.mxu0 }
  0xf1   : > { %1492 = vst [vmem:[%s1668_s15 + $0x10] sm:$0xff] %v1444_v5   ;;  %v729_v10 = vpop.f32.mrf.mxu1  ;;  %v953_v11 = vmax.f32 %v903_v8, %v928_v9 }
  0xf2   : > { %v905_v27 = vmax.f32 %v667_v59, %v729_v10 }
  0xf3   : > { %v982_v17 = vadd.f32 %v1657_v2, %v953_v11 }
  0xf5   : > { %v1007_v21 = vmax.f32 %v982_v17, 0.0 }
  0xf6   : > { %v789_v12 = vpop.f32.mrf.mxu2 }
  0xf7   : > { %v929_v14 = vmax.f32 %v789_v12, %v852_v6  ;;  %v854_v15 = vpop.f32.mrf.mxu3 }
  0xf8   : > { %v672_v16 = vpop.f32.mrf.mxu0 }
  0xf9   : > { %v954_v18 = vmax.f32 %v904_v13, %v929_v14  ;;  %v732_v19 = vpop.f32.mrf.mxu1 }
  0xfa   : > { %v906_v32 = vmax.f32 %v669_v7, %v732_v19 }
  0xfb   : > { %v983_v20 = vadd.f32 %v1657_v2, %v954_v18 }
  0xfd   : > { %v1008_v22 = vmax.f32 %v983_v20, 0.0 }
  0xfe   : > { %v792_v23 = vpop.f32.mrf.mxu2 }
  0xff   : > { %v1449_v24 = vpack.c.bf16 %v1008_v22, %v1007_v21  ;;  %v857_v25 = vpop.f32.mrf.mxu3  ;;  %v930_v28 = vmax.f32 %v792_v23, %v854_v15 }
 0x100   : > { %v674_v26 = vpop.f32.mrf.mxu0 }
 0x101   : > { %1493 = vst [vmem:[%s1668_s15 + $0x18] sm:$0xff] %v1449_v24   ;;  %v734_v29 = vpop.f32.mrf.mxu1  ;;  %v955_v30 = vmax.f32 %v905_v27, %v930_v28 }
 0x102   : > { %v907_v49 = vmax.f32 %v672_v16, %v734_v29 }
 0x103   : > { %v984_v36 = vadd.f32 %v1657_v2, %v955_v30 }
 0x105   : > { %v1009_v40 = vmax.f32 %v984_v36, 0.0 }
 0x106   : > { %v794_v31 = vpop.f32.mrf.mxu2 }
 0x107   : > { %v931_v33 = vmax.f32 %v794_v31, %v857_v25  ;;  %v859_v34 = vpop.f32.mrf.mxu3 }
 0x108   : > { %v677_v35 = vpop.f32.mrf.mxu0 }
 0x109   : > { %v956_v37 = vmax.f32 %v906_v32, %v931_v33  ;;  %v737_v38 = vpop.f32.mrf.mxu1 }
 0x10a   : > { %v908_v56 = vmax.f32 %v674_v26, %v737_v38 }
 0x10b   : > { %v985_v39 = vadd.f32 %v1657_v2, %v956_v37 }
 0x10d   : > { %v1010_v41 = vmax.f32 %v985_v39, 0.0 }
 0x10e   : > { %v797_v42 = vpop.f32.mrf.mxu2 }
 0x10f   : > { %v1454_v43 = vpack.c.bf16 %v1010_v41, %v1009_v40  ;;  %v862_v44 = vpop.f32.mrf.mxu3  ;;  %v932_v52 = vmax.f32 %v797_v42, %v859_v34 }
 0x110   : > { %v679_v48 = vpop.f32.mrf.mxu0 }
 0x111   : > { %1494 = vst [vmem:[%s1668_s15 + $0x20] sm:$0xff] %v1454_v43   ;;  %v739_v53 = vpop.f32.mrf.mxu1  ;;  %v957_v54 = vmax.f32 %v907_v49, %v932_v52 }
 0x112   : > { %v909_v6 = vmax.f32 %v677_v35, %v739_v53 }
 0x113   : > { %v986_v59 = vadd.f32 %v1657_v2, %v957_v54 }
 0x115   : > { %v1011_v0 = vmax.f32 %v986_v59, 0.0 }
 0x116   : > { %v799_v55 = vpop.f32.mrf.mxu2 }
 0x117   : > { %v933_v57 = vmax.f32 %v799_v55, %v862_v44  ;;  %v864_v58 = vpop.f32.mrf.mxu3 }
 0x118   : > { %v682_v62 = vpop.f32.mrf.mxu0 }
 0x119   : > { %v958_v60 = vmax.f32 %v908_v56, %v933_v57  ;;  %v742_v61 = vpop.f32.mrf.mxu1 }
 0x11a   : > { %v910_v12 = vmax.f32 %v679_v48, %v742_v61 }
 0x11b   : > { %v987_v63 = vadd.f32 %v1657_v2, %v958_v60 }
 0x11d   : > { %v1012_v1 = vmax.f32 %v987_v63, 0.0 }
 0x11e   : > { %v802_v3 = vpop.f32.mrf.mxu2 }
 0x11f   : > { %v1459_v4 = vpack.c.bf16 %v1012_v1, %v1011_v0  ;;  %v867_v5 = vpop.f32.mrf.mxu3  ;;  %v934_v7 = vmax.f32 %v802_v3, %v864_v58 }
 0x120   : > { %v684_v9 = vpop.f32.mrf.mxu0 }
 0x121   : > { %1495 = vst [vmem:[%s1668_s15 + $0x28] sm:$0xff] %v1459_v4   ;;  %v744_v8 = vpop.f32.mrf.mxu1  ;;  %v959_v10 = vmax.f32 %v909_v6, %v934_v7 }
 0x122   : > { %v911_v25 = vmax.f32 %v682_v62, %v744_v8 }
 0x123   : > { %v988_v15 = vadd.f32 %v1657_v2, %v959_v10 }
 0x125   : > { %v1013_v19 = vmax.f32 %v988_v15, 0.0 }
 0x126   : > { %v804_v11 = vpop.f32.mrf.mxu2 }
 0x127   : > { %v935_v13 = vmax.f32 %v804_v11, %v867_v5  ;;  %v869_v14 = vpop.f32.mrf.mxu3 }
 0x128   : > { %v687_v21 = vpop.f32.mrf.mxu0 }
 0x129   : > { %v960_v16 = vmax.f32 %v910_v12, %v935_v13  ;;  %v747_v17 = vpop.f32.mrf.mxu1 }
 0x12a   : > { %v912_v30 = vmax.f32 %v684_v9, %v747_v17 }
 0x12b   : > { %v989_v18 = vadd.f32 %v1657_v2, %v960_v16 }
 0x12d   : > { %v1014_v20 = vmax.f32 %v989_v18, 0.0 }
 0x12e   : > { %v807_v22 = vpop.f32.mrf.mxu2 }
 0x12f   : > { %v1464_v23 = vpack.c.bf16 %v1014_v20, %v1013_v19  ;;  %v872_v24 = vpop.f32.mrf.mxu3  ;;  %v936_v26 = vmax.f32 %v807_v22, %v869_v14 }
 0x130   : > { %v689_v33 = vpop.f32.mrf.mxu0 }
 0x131   : > { %1496 = vst [vmem:[%s1668_s15 + $0x30] sm:$0xff] %v1464_v23   ;;  %v749_v27 = vpop.f32.mrf.mxu1  ;;  %v961_v28 = vmax.f32 %v911_v25, %v936_v26 }
 0x132   : > { %v913_v43 = vmax.f32 %v687_v21, %v749_v27 }
 0x133   : > { %v990_v34 = vadd.f32 %v1657_v2, %v961_v28 }
 0x135   : > { %v1015_v38 = vmax.f32 %v990_v34, 0.0 }
 0x136   : > { %v809_v29 = vpop.f32.mrf.mxu2 }
 0x137   : > { %v937_v31 = vmax.f32 %v809_v29, %v872_v24  ;;  %v874_v32 = vpop.f32.mrf.mxu3 }
 0x138   : > { %v692_v48 = vpop.f32.mrf.mxu0 }
 0x139   : > { %v962_v35 = vmax.f32 %v912_v30, %v937_v31  ;;  %v752_v37 = vpop.f32.mrf.mxu1 }
 0x13a   : > { %v914_v54 = vmax.f32 %v689_v33, %v752_v37 }
 0x13b   : > { %v991_v36 = vadd.f32 %v1657_v2, %v962_v35 }
 0x13d   : > { %v1016_v39 = vmax.f32 %v991_v36, 0.0 }
 0x13e   : > { %v812_v40 = vpop.f32.mrf.mxu2 }
 0x13f   : > { %v1469_v41 = vpack.c.bf16 %v1016_v39, %v1015_v38  ;;  %v877_v42 = vpop.f32.mrf.mxu3  ;;  %v938_v44 = vmax.f32 %v812_v40, %v874_v32 }
 0x140   : > { %v694_v60 = vpop.f32.mrf.mxu0 }
 0x141   : > { %1497 = vst [vmem:[%s1668_s15 + $0x38] sm:$0xff] %v1469_v41   ;;  %v963_v49 = vmax.f32 %v913_v43, %v938_v44  ;;  %v754_v52 = vpop.f32.mrf.mxu1 }
 0x142   : > { %v915_v4 = vmax.f32 %v692_v48, %v754_v52 }
 0x143   : > { %v992_v57 = vadd.f32 %v1657_v2, %v963_v49 }
 0x145   : > { %v1017_v61 = vmax.f32 %v992_v57, 0.0 }
 0x146   : > { %v814_v53 = vpop.f32.mrf.mxu2 }
 0x147   : > { %v939_v55 = vmax.f32 %v814_v53, %v877_v42  ;;  %v879_v56 = vpop.f32.mrf.mxu3 }
 0x148   : > { %v697_v7 = vpop.f32.mrf.mxu0 }
 0x149   : > { %v964_v58 = vmax.f32 %v914_v54, %v939_v55  ;;  %v757_v3 = vpop.f32.mrf.mxu1 }
 0x14a   : > { %v916_v9 = vmax.f32 %v694_v60, %v757_v3 }
 0x14b   : > { %v993_v59 = vadd.f32 %v1657_v2, %v964_v58 }
 0x14d   : > { %v1018_v62 = vmax.f32 %v993_v59, 0.0 }
 0x14e   : > { %v817_v63 = vpop.f32.mrf.mxu2 }
 0x14f   : > { %v1474_v0 = vpack.c.bf16 %v1018_v62, %v1017_v61  ;;  %v882_v1 = vpop.f32.mrf.mxu3  ;;  %v940_v5 = vmax.f32 %v817_v63, %v879_v56 }
 0x150   : > { %v699_v21 = vpop.f32.mrf.mxu0 }
 0x151   : > { %1498 = vst [vmem:[%s1668_s15 + $0x40] sm:$0xff] %v1474_v0   ;;  %v965_v6 = vmax.f32 %v915_v4, %v940_v5  ;;  %v759_v14 = vpop.f32.mrf.mxu1 }
 0x152   : > { %v917_v22 = vmax.f32 %v697_v7, %v759_v14 }
 0x153   : > { %v994_v12 = vadd.f32 %v1657_v2, %v965_v6 }
 0x155   : > { %v1019_v16 = vmax.f32 %v994_v12, 0.0 }
 0x156   : > { %v819_v8 = vpop.f32.mrf.mxu2 }
 0x157   : > { %v941_v10 = vmax.f32 %v819_v8, %v882_v1  ;;  %v884_v11 = vpop.f32.mrf.mxu3 }
 0x158   : > { %v702_v32 = vpop.f32.mrf.mxu0 }
 0x159   : > { %v966_v13 = vmax.f32 %v916_v9, %v941_v10  ;;  %v762_v24 = vpop.f32.mrf.mxu1 }
 0x15a   : > { %v918_v27 = vmax.f32 %v699_v21, %v762_v24 }
 0x15b   : > { %v995_v15 = vadd.f32 %v1657_v2, %v966_v13 }
 0x15d   : > { %v1020_v17 = vmax.f32 %v995_v15, 0.0 }
 0x15e   : > { %v822_v18 = vpop.f32.mrf.mxu2 }
 0x15f   : > { %v1479_v19 = vpack.c.bf16 %v1020_v17, %v1019_v16  ;;  %v887_v20 = vpop.f32.mrf.mxu3  ;;  %v942_v23 = vmax.f32 %v822_v18, %v884_v11 }
 0x160   : > { %v704_v42 = vpop.f32.mrf.mxu0 }
 0x161   : > { %1499 = vst [vmem:[%s1668_s15 + $0x48] sm:$0xff] %v1479_v19   ;;  %v967_v25 = vmax.f32 %v917_v22, %v942_v23  ;;  %v764_v36 = vpop.f32.mrf.mxu1  ;;  %v920_v48 = vmax.f32 %v704_v42, %v1640_v46 }
 0x162   : > { %v919_v40 = vmax.f32 %v702_v32, %v764_v36 }
 0x163   : > { %v996_v30 = vadd.f32 %v1657_v2, %v967_v25 }
 0x165   : > { %v1021_v34 = vmax.f32 %v996_v30, 0.0 }
 0x166   : > { %v824_v26 = vpop.f32.mrf.mxu2 }
 0x167   : > { %v943_v28 = vmax.f32 %v824_v26, %v887_v20  ;;  %v889_v29 = vpop.f32.mrf.mxu3 }
 0x169   : > { %v968_v31 = vmax.f32 %v918_v27, %v943_v28 }
 0x16b   : > { %v997_v33 = vadd.f32 %v1657_v2, %v968_v31 }
 0x16d   : > { %v1022_v35 = vmax.f32 %v997_v33, 0.0 }
 0x16e   : > { %v827_v37 = vpop.f32.mrf.mxu2 }
 0x16f   : > { %v1484_v38 = vpack.c.bf16 %v1022_v35, %v1021_v34  ;;  %v892_v39 = vpop.f32.mrf.mxu3  ;;  %v944_v41 = vmax.f32 %v827_v37, %v889_v29 }
 0x171   : > { %1500 = vst [vmem:[%s1668_s15 + $0x50] sm:$0xff] %v1484_v38   ;;  %v969_v43 = vmax.f32 %v919_v40, %v944_v41 }
 0x173   : > { %v998_v54 = vadd.f32 %v1657_v2, %v969_v43 }
 0x175   : > { %v1023_v59 = vmax.f32 %v998_v54, 0.0 }
 0x176   : > { %v829_v44 = vpop.f32.mrf.mxu2 }
 0x177   : > { %v945_v49 = vmax.f32 %v829_v44, %v892_v39  ;;  %v894_v52 = vpop.f32.mrf.mxu3 }
 0x178   : > { %v946_v53 = vmax.f32 %v1642_v47, %v894_v52 }
 0x179   : > { %v970_v55 = vmax.f32 %v920_v48, %v945_v49 }
 0x17a   : > { %v971_v56 = vmax.f32 %v921_v51, %v946_v53 }
 0x17b   : > { %v999_v57 = vadd.f32 %v1657_v2, %v970_v55 }
 0x17c   : > { %v1000_v58 = vadd.f32 %v1657_v2, %v971_v56 }
 0x17d   : > { %v1024_v60 = vmax.f32 %v999_v57, 0.0 }
 0x17e   : > { %v1025_v61 = vmax.f32 %v1000_v58, 0.0 }
 0x17f   : > { %v1489_v62 = vpack.c.bf16 %v1024_v60, %v1023_v59 }
 0x180   : > { %v1050_v46 = vpack.c.bf16 %v1025_v61, %v1025_v61 }
 0x181   : > { %1501 = vst [vmem:[%s1668_s15 + $0x58] sm:$0xff] %v1489_v62  }
 0x182   : > { %1075 = vst [vmem:[%s1668_s15 + $0x60] sm:$0xf] %v1050_v46 }
 0x183 PF: > { %s13_s12 = sadd.s32 1, %s1541_s12  }
 0x184   : > { %p10_p5 = scmp.ge.s32.totalorder %s13_s12, 4  }
 0x186   :  { %12 = sbr.rel (!%p10_p5) target bundleno = 1 (0x1), region = 62 }

// kernel: net_forward.4
= control target key start
LH: loop header
LB: loop body
LE: loop exit
PB: predicated region body
PF: predicated region fallthrough
CT: control target
= control target key end

     0   :  { %s1069_s1 = inlined_call_operand.vmem [shape: bf16[256,128], index: 1, kind: input, shape index: {}]   ;;  %s1070_s0 = inlined_call_operand.vmem [shape: bf16[224,256], index: 0, kind: input, shape index: {}]   ;;  %s1071_s2 = inlined_call_operand.vmem [shape: f32[1,128], index: 2, kind: input, shape index: {}]   ;;  %s1072_s3 = inlined_call_operand.vmem [shape: bf16[56,128], index: 3, kind: output, shape index: {}]  }
   0x1   :  { %v736_v0 = vld [vmem:[%s1069_s1 + $0x38] sm:$0xff]  ;;  %v735_v2 = vld [vmem:[%s1069_s1 + $0x30] sm:$0xff]  ;;  %v734_v4 = vld [vmem:[%s1069_s1 + $0x28] sm:$0xff] }
   0x2   :  { %v744_v1 = vld [vmem:[%s1069_s1 + $0x78] sm:$0xff]  ;;  %310 = vmatpush.bf16.msra.mxu0 %v736_v0  ;;  %762 = vmatpush.bf16.msra.mxu2 %v736_v0  ;;  %v743_v3 = vld [vmem:[%s1069_s1 + $0x70] sm:$0xff]  ;;  %v742_v5 = vld [vmem:[%s1069_s1 + $0x68] sm:$0xff] }
   0x3   :  { %389 = vmatpush.bf16.msra.mxu1 %v744_v1  ;;  %770 = vmatpush.bf16.msra.mxu3 %v744_v1  ;;  %v733_v6 = vld [vmem:[%s1069_s1 + $0x20] sm:$0xff]  ;;  %v732_v8 = vld [vmem:[%s1069_s1 + $0x18] sm:$0xff]  ;;  %v731_v10 = vld [vmem:[%s1069_s1 + $0x10] sm:$0xff] }
   0x4   :  { %v741_v7 = vld [vmem:[%s1069_s1 + $0x60] sm:$0xff]  ;;  %v740_v9 = vld [vmem:[%s1069_s1 + $0x58] sm:$0xff]  ;;  %v739_v11 = vld [vmem:[%s1069_s1 + $0x50] sm:$0xff] }
   0x5   :  { %v730_v12 = vld [vmem:[%s1069_s1 + $0x8] sm:$0xff]  ;;  %v729_v14 = vld [vmem:[%s1069_s1] sm:$0xff]  ;;  %v583_v18 = vld [vmem:[%s1070_s0 + $0x70] sm:$0xf] }
   0x6   :  { %311 = vmatpush.bf16.msra.mxu0 %v735_v2  ;;  %763 = vmatpush.bf16.msra.mxu2 %v735_v2  ;;  %v738_v13 = vld [vmem:[%s1069_s1 + $0x48] sm:$0xff]  ;;  %v737_v15 = vld [vmem:[%s1069_s1 + $0x40] sm:$0xff]  ;;  %v716_v19 = vld [vmem:[%s1070_s0 + $0x74] sm:$0xf0] }
   0x7   :  { %390 = vmatpush.bf16.msra.mxu1 %v743_v3  ;;  %771 = vmatpush.bf16.msra.mxu3 %v743_v3  ;;  %v527_v16 = vld [vmem:[%s1070_s0] sm:$0xf]  ;;  %v702_v17 = vld [vmem:[%s1070_s0 + $0x4] sm:$0xf0]  ;;  %v701_v20 = vld [vmem:[%s1070_s0 + $0x4] sm:$0xf]  ;;  %v584_v25 = vor.u32 %v716_v19, %v583_v18 }
   0x8   :  { %v529_v21 = vld [vmem:[%s1070_s0 + $0x8] sm:$0xf0]  ;;  %v715_v22 = vld [vmem:[%s1070_s0 + $0x74] sm:$0xf]  ;;  %v585_v23 = vld [vmem:[%s1070_s0 + $0x78] sm:$0xf0]  ;;  %v528_v24 = vor.u32 %v702_v17, %v527_v16 }
   0x9   :  { %v532_v26 = vor.u32 %v701_v20, %v529_v21  ;;  %v588_v27 = vor.u32 %v715_v22, %v585_v23  ;;  %v535_v28 = vld [vmem:[%s1070_s0 + $0x10] sm:$0xf]  ;;  %v704_v29 = vld [vmem:[%s1070_s0 + $0x14] sm:$0xf0]  ;;  %v591_v30 = vld [vmem:[%s1070_s0 + $0x80] sm:$0xf] }
   0xa   :  { %312 = vmatpush.bf16.msra.mxu0 %v734_v4  ;;  %764 = vmatpush.bf16.msra.mxu2 %v734_v4  ;;  %v718_v31 = vld [vmem:[%s1070_s0 + $0x84] sm:$0xf0]  ;;  %v703_v32 = vld [vmem:[%s1070_s0 + $0x14] sm:$0xf]  ;;  %v537_v33 = vld [vmem:[%s1070_s0 + $0x18] sm:$0xf0]  ;;  %v536_v36 = vor.u32 %v704_v29, %v535_v28 }
   0xb   :  { %391 = vmatpush.bf16.msra.mxu1 %v742_v5  ;;  %772 = vmatpush.bf16.msra.mxu3 %v742_v5  ;;  %v717_v34 = vld [vmem:[%s1070_s0 + $0x84] sm:$0xf]  ;;  %v593_v35 = vld [vmem:[%s1070_s0 + $0x88] sm:$0xf0]  ;;  %v592_v37 = vor.u32 %v718_v31, %v591_v30  ;;  %v540_v38 = vor.u32 %v703_v32, %v537_v33  ;;  %v543_v40 = vld [vmem:[%s1070_s0 + $0x20] sm:$0xf] }
   0xc   :  { %v596_v39 = vor.u32 %v717_v34, %v593_v35  ;;  %v706_v41 = vld [vmem:[%s1070_s0 + $0x24] sm:$0xf0]  ;;  %v599_v42 = vld [vmem:[%s1070_s0 + $0x90] sm:$0xf]  ;;  %v720_v43 = vld [vmem:[%s1070_s0 + $0x94] sm:$0xf0] }
   0xd   :  { %v705_v44 = vld [vmem:[%s1070_s0 + $0x24] sm:$0xf]  ;;  %v545_v45 = vld [vmem:[%s1070_s0 + $0x28] sm:$0xf0]  ;;  %v719_v46 = vld [vmem:[%s1070_s0 + $0x94] sm:$0xf]  ;;  %v544_v48 = vor.u32 %v706_v41, %v543_v40  ;;  %v600_v49 = vor.u32 %v720_v43, %v599_v42 }
   0xe   :  { %313 = vmatpush.bf16.msra.mxu0 %v733_v6  ;;  %765 = vmatpush.bf16.msra.mxu2 %v733_v6  ;;  %v601_v47 = vld [vmem:[%s1070_s0 + $0x98] sm:$0xf0]  ;;  %v548_v50 = vor.u32 %v705_v44, %v545_v45  ;;  %v551_v52 = vld [vmem:[%s1070_s0 + $0x30] sm:$0xf]  ;;  %v708_v53 = vld [vmem:[%s1070_s0 + $0x34] sm:$0xf0] }
   0xf   :  { %392 = vmatpush.bf16.msra.mxu1 %v741_v7  ;;  %773 = vmatpush.bf16.msra.mxu3 %v741_v7  ;;  %v604_v51 = vor.u32 %v719_v46, %v601_v47  ;;  %v607_v54 = vld [vmem:[%s1070_s0 + $0xa0] sm:$0xf]  ;;  %v722_v55 = vld [vmem:[%s1070_s0 + $0xa4] sm:$0xf0]  ;;  %v707_v56 = vld [vmem:[%s1070_s0 + $0x34] sm:$0xf]  ;;  %v552_v60 = vor.u32 %v708_v53, %v551_v52 }
  0x10   :  { %v553_v57 = vld [vmem:[%s1070_s0 + $0x38] sm:$0xf0]  ;;  %v721_v58 = vld [vmem:[%s1070_s0 + $0xa4] sm:$0xf]  ;;  %v609_v59 = vld [vmem:[%s1070_s0 + $0xa8] sm:$0xf0]  ;;  %v608_v61 = vor.u32 %v722_v55, %v607_v54 }
  0x11   :  { %v556_v62 = vor.u32 %v707_v56, %v553_v57  ;;  %v612_v63 = vor.u32 %v721_v58, %v609_v59  ;;  %v559_v0 = vld [vmem:[%s1070_s0 + $0x40] sm:$0xf]  ;;  %v710_v1 = vld [vmem:[%s1070_s0 + $0x44] sm:$0xf0]  ;;  %v615_v2 = vld [vmem:[%s1070_s0 + $0xb0] sm:$0xf] }
  0x12   :  { %314 = vmatpush.bf16.msra.mxu0 %v732_v8  ;;  %766 = vmatpush.bf16.msra.mxu2 %v732_v8  ;;  %v724_v3 = vld [vmem:[%s1070_s0 + $0xb4] sm:$0xf0]  ;;  %v709_v4 = vld [vmem:[%s1070_s0 + $0x44] sm:$0xf]  ;;  %v561_v5 = vld [vmem:[%s1070_s0 + $0x48] sm:$0xf0]  ;;  %v560_v8 = vor.u32 %v710_v1, %v559_v0 }
  0x13   :  { %393 = vmatpush.bf16.msra.mxu1 %v740_v9  ;;  %774 = vmatpush.bf16.msra.mxu3 %v740_v9  ;;  %v723_v6 = vld [vmem:[%s1070_s0 + $0xb4] sm:$0xf]  ;;  %v617_v7 = vld [vmem:[%s1070_s0 + $0xb8] sm:$0xf0]  ;;  %v616_v9 = vor.u32 %v724_v3, %v615_v2  ;;  %v725_v18 = vld [vmem:[%s1070_s0 + $0xc4] sm:$0xf] }
  0x14   :  { %v711_v16 = vld [vmem:[%s1070_s0 + $0x54] sm:$0xf]  ;;  %v569_v17 = vld [vmem:[%s1070_s0 + $0x58] sm:$0xf0]  ;;  %v625_v19 = vld [vmem:[%s1070_s0 + $0xc8] sm:$0xf0] }
  0x15   :  { %v572_v22 = vor.u32 %v711_v16, %v569_v17  ;;  %v628_v23 = vor.u32 %v725_v18, %v625_v19  ;;  %v713_v28 = vld [vmem:[%s1070_s0 + $0x64] sm:$0xf]  ;;  %v577_v29 = vld [vmem:[%s1070_s0 + $0x68] sm:$0xf0]  ;;  %v727_v30 = vld [vmem:[%s1070_s0 + $0xd4] sm:$0xf] }
  0x16   :  { %315 = vmatpush.bf16.msra.mxu0 %v731_v10  ;;  %767 = vmatpush.bf16.msra.mxu2 %v731_v10  ;;  %v564_v10 = vor.u32 %v709_v4, %v561_v5  ;;  %v633_v31 = vld [vmem:[%s1070_s0 + $0xd8] sm:$0xf0]  ;;  %v580_v34 = vor.u32 %v713_v28, %v577_v29 }
  0x17   :  { %394 = vmatpush.bf16.msra.mxu1 %v739_v11  ;;  %775 = vmatpush.bf16.msra.mxu3 %v739_v11  ;;  %v620_v11 = vor.u32 %v723_v6, %v617_v7  ;;  %v636_v35 = vor.u32 %v727_v30, %v633_v31 }
  0x1a   :  { %316 = vmatpush.bf16.msra.mxu0 %v730_v12  ;;  %768 = vmatpush.bf16.msra.mxu2 %v730_v12  ;;  %v567_v12 = vld [vmem:[%s1070_s0 + $0x50] sm:$0xf] }
  0x1b   :  { %395 = vmatpush.bf16.msra.mxu1 %v738_v13  ;;  %776 = vmatpush.bf16.msra.mxu3 %v738_v13  ;;  %v712_v13 = vld [vmem:[%s1070_s0 + $0x54] sm:$0xf0] }
  0x1c   :  { %v568_v20 = vor.u32 %v712_v13, %v567_v12 }
  0x1e   :  { %317 = vmatpush.bf16.msra.mxu0 %v729_v14  ;;  %769 = vmatpush.bf16.msra.mxu2 %v729_v14  ;;  %v623_v14 = vld [vmem:[%s1070_s0 + $0xc0] sm:$0xf] }
  0x1f   :  { %396 = vmatpush.bf16.msra.mxu1 %v737_v15  ;;  %777 = vmatpush.bf16.msra.mxu3 %v737_v15  ;;  %v726_v15 = vld [vmem:[%s1070_s0 + $0xc4] sm:$0xf0] }
  0x20   :  { %v624_v21 = vor.u32 %v726_v15, %v623_v14 }
  0x21   :  { %318 = vmatmul.bf16.vlgmr.msra.gmra.mxu0 %v528_v24  ;;  %353 = vmatmul.bf16.vlgmr.msra.gmra.mxu2 %v584_v25  ;;  %v575_v24 = vld [vmem:[%s1070_s0 + $0x60] sm:$0xf]  ;;  %v714_v25 = vld [vmem:[%s1070_s0 + $0x64] sm:$0xf0] }
  0x22   :  { %397 = vmatmul.bf16.vlgmr.msra.gmra.mxu1 %v532_v26  ;;  %432 = vmatmul.bf16.vlgmr.msra.gmra.mxu3 %v588_v27  ;;  %v631_v26 = vld [vmem:[%s1070_s0 + $0xd0] sm:$0xf]  ;;  %v728_v27 = vld [vmem:[%s1070_s0 + $0xd4] sm:$0xf0]  ;;  %v576_v32 = vor.u32 %v714_v25, %v575_v24 }
  0x23   :  { %v632_v33 = vor.u32 %v728_v27, %v631_v26 }
  0x31   :  { %323 = vmatmul.bf16.gmra.mxu0 %v536_v36  ;;  %358 = vmatmul.bf16.gmra.mxu2 %v592_v37 }
  0x32   :  { %402 = vmatmul.bf16.gmra.mxu1 %v540_v38  ;;  %437 = vmatmul.bf16.gmra.mxu3 %v596_v39 }
  0x41   :  { %328 = vmatmul.bf16.gmra.mxu0 %v544_v48  ;;  %363 = vmatmul.bf16.gmra.mxu2 %v600_v49 }
  0x42   :  { %407 = vmatmul.bf16.gmra.mxu1 %v548_v50  ;;  %442 = vmatmul.bf16.gmra.mxu3 %v604_v51 }
  0x51   :  { %333 = vmatmul.bf16.gmra.mxu0 %v552_v60  ;;  %368 = vmatmul.bf16.gmra.mxu2 %v608_v61 }
  0x52   :  { %412 = vmatmul.bf16.gmra.mxu1 %v556_v62  ;;  %447 = vmatmul.bf16.gmra.mxu3 %v612_v63 }
  0x61   :  { %338 = vmatmul.bf16.gmra.mxu0 %v560_v8  ;;  %373 = vmatmul.bf16.gmra.mxu2 %v616_v9 }
  0x62   :  { %417 = vmatmul.bf16.gmra.mxu1 %v564_v10  ;;  %452 = vmatmul.bf16.gmra.mxu3 %v620_v11 }
  0x71   :  { %343 = vmatmul.bf16.gmra.mxu0 %v568_v20  ;;  %378 = vmatmul.bf16.gmra.mxu2 %v624_v21 }
  0x72   :  { %422 = vmatmul.bf16.gmra.mxu1 %v572_v22  ;;  %457 = vmatmul.bf16.gmra.mxu3 %v628_v23  ;;  %v1038_v22 = vld [vmem:[%s1071_s2] ss:$0 sm:$0xff] }
  0x81   :  { %348 = vmatmul.bf16.gmra.mxu0 %v576_v32  ;;  %383 = vmatmul.bf16.gmra.mxu2 %v632_v33 }
  0x82   :  { %427 = vmatmul.bf16.gmra.mxu1 %v580_v34  ;;  %462 = vmatmul.bf16.gmra.mxu3 %v636_v35 }
  0x9e   :  { %v319_v36 = vpop.f32.mrf.mxu0 }
  0x9f   :  { %v398_v37 = vpop.f32.mrf.mxu1 }
  0xa0   :  { %v399_v38 = vadd.f32 %v398_v37, %v319_v36 }
  0xa4   :  { %v354_v39 = vpop.f32.mrf.mxu2 }
  0xa5   :  { %v433_v40 = vpop.f32.mrf.mxu3 }
  0xa6   :  { %v434_v41 = vadd.f32 %v433_v40, %v354_v39  ;;  %v321_v42 = vpop.f32.mrf.mxu0 }
  0xa7   :  { %v400_v43 = vpop.f32.mrf.mxu1 }
  0xa8   :  { %v401_v20 = vadd.f32 %v400_v43, %v321_v42 }
  0xac   :  { %v356_v44 = vpop.f32.mrf.mxu2 }
  0xad   :  { %v435_v45 = vpop.f32.mrf.mxu3 }
  0xae   :  { %v324_v46 = vpop.f32.mrf.mxu0  ;;  %v436_v21 = vadd.f32 %v435_v45, %v356_v44 }
  0xaf   :  { %v403_v47 = vpop.f32.mrf.mxu1 }
  0xb0   :  { %v404_v48 = vadd.f32 %v403_v47, %v324_v46 }
  0xb4   :  { %v359_v49 = vpop.f32.mrf.mxu2 }
  0xb5   :  { %v438_v50 = vpop.f32.mrf.mxu3 }
  0xb6   :  { %v439_v51 = vadd.f32 %v438_v50, %v359_v49  ;;  %v326_v52 = vpop.f32.mrf.mxu0 }
  0xb7   :  { %v405_v53 = vpop.f32.mrf.mxu1 }
  0xb8   :  { %v406_v46 = vadd.f32 %v405_v53, %v326_v52 }
  0xbc   :  { %v361_v54 = vpop.f32.mrf.mxu2 }
  0xbd   :  { %v440_v55 = vpop.f32.mrf.mxu3 }
  0xbe   :  { %v329_v56 = vpop.f32.mrf.mxu0  ;;  %v441_v47 = vadd.f32 %v440_v55, %v361_v54 }
  0xbf   :  { %v408_v57 = vpop.f32.mrf.mxu1 }
  0xc0   :  { %v1015_v58 = vadd.f32 %v408_v57, %v329_v56 }
  0xc4   :  { %v364_v59 = vpop.f32.mrf.mxu2 }
  0xc5   :  { %v443_v60 = vpop.f32.mrf.mxu3 }
  0xc6   :  { %v1017_v61 = vadd.f32 %v443_v60, %v364_v59  ;;  %v1019_v62 = vpop.f32.mrf.mxu0 }
  0xc7   :  { %v1021_v63 = vpop.f32.mrf.mxu1 }
  0xcc   :  { %v1023_v0 = vpop.f32.mrf.mxu2 }
  0xcd   :  { %v1025_v1 = vpop.f32.mrf.mxu3 }
  0xce   :  { %v1027_v2 = vpop.f32.mrf.mxu0 }
  0xcf   :  { %v1029_v3 = vpop.f32.mrf.mxu1 }
  0xd4   :  { %v1031_v4 = vpop.f32.mrf.mxu2 }
  0xd5   :  { %v1033_v5 = vpop.f32.mrf.mxu3 }
  0xd6   :  { %v336_v6 = vpop.f32.mrf.mxu0 }
  0xd7   :  { %v415_v7 = vpop.f32.mrf.mxu1 }
  0xd8   :  { %v416_v8 = vadd.f32 %v415_v7, %v336_v6 }
  0xda   :  { %v468_v14 = vmax.f32 %v399_v38, %v416_v8 }
  0xdc   :  { %v371_v9 = vpop.f32.mrf.mxu2 }
  0xdd   :  { %v450_v10 = vpop.f32.mrf.mxu3 }
  0xde   :  { %v451_v11 = vadd.f32 %v450_v10, %v371_v9  ;;  %v339_v12 = vpop.f32.mrf.mxu0 }
  0xdf   :  { %v418_v13 = vpop.f32.mrf.mxu1 }
  0xe0   :  { %v475_v15 = vmax.f32 %v434_v41, %v451_v11  ;;  %v419_v17 = vadd.f32 %v418_v13, %v339_v12 }
  0xe2   :  { %v482_v16 = vmax.f32 %v468_v14, %v475_v15  ;;  %v469_v26 = vmax.f32 %v401_v20, %v419_v17  ;;  %v411_v17 = vadd.f32 %v1021_v63, %v1019_v62  ;;  %v449_v62 = vadd.f32 %v1033_v5, %v1031_v4 }
  0xe4   :  { %v374_v18 = vpop.f32.mrf.mxu2  ;;  %v493_v28 = vadd.f32 %v1038_v22, %v482_v16 }
  0xe5   :  { %v453_v19 = vpop.f32.mrf.mxu3 }
  0xe6   :  { %v454_v23 = vadd.f32 %v453_v19, %v374_v18  ;;  %v341_v24 = vpop.f32.mrf.mxu0  ;;  %v500_v34 = vmax.f32 %v493_v28, 0.0  ;;  %v446_v18 = vadd.f32 %v1025_v1, %v1023_v0  ;;  %v414_v28 = vadd.f32 %v1029_v3, %v1027_v2 }
  0xe7   :  { %v420_v25 = vpop.f32.mrf.mxu1 }
  0xe8   :  { %v476_v27 = vmax.f32 %v436_v21, %v454_v23  ;;  %v421_v31 = vadd.f32 %v420_v25, %v341_v24 }
  0xea   :  { %v483_v29 = vmax.f32 %v469_v26, %v476_v27  ;;  %v470_v40 = vmax.f32 %v404_v48, %v421_v31 }
  0xec   :  { %v494_v30 = vadd.f32 %v1038_v22, %v483_v29  ;;  %v376_v32 = vpop.f32.mrf.mxu2 }
  0xed   :  { %v455_v33 = vpop.f32.mrf.mxu3 }
  0xee   :  { %v501_v35 = vmax.f32 %v494_v30, 0.0  ;;  %v456_v36 = vadd.f32 %v455_v33, %v376_v32  ;;  %v344_v37 = vpop.f32.mrf.mxu0 }
  0xef   :  { %v423_v38 = vpop.f32.mrf.mxu1 }
  0xf0   :  { %v748_v39 = vpack.c.bf16 %v501_v35, %v500_v34  ;;  %v477_v41 = vmax.f32 %v439_v51, %v456_v36  ;;  %v424_v43 = vadd.f32 %v423_v38, %v344_v37 }
  0xf2   :  { %749 = vst [vmem:[%s1072_s3] sm:$0xff] %v748_v39   ;;  %v484_v42 = vmax.f32 %v470_v40, %v477_v41  ;;  %v471_v57 = vmax.f32 %v406_v46, %v424_v43 }
  0xf4   :  { %v379_v44 = vpop.f32.mrf.mxu2  ;;  %v495_v60 = vadd.f32 %v1038_v22, %v484_v42 }
  0xf5   :  { %v458_v45 = vpop.f32.mrf.mxu3 }
  0xf6   :  { %v459_v49 = vadd.f32 %v458_v45, %v379_v44  ;;  %v346_v50 = vpop.f32.mrf.mxu0  ;;  %v502_v9 = vmax.f32 %v495_v60, 0.0 }
  0xf7   :  { %v425_v56 = vpop.f32.mrf.mxu1 }
  0xf8   :  { %v478_v59 = vmax.f32 %v441_v47, %v459_v49  ;;  %v426_v51 = vadd.f32 %v425_v56, %v346_v50 }
  0xfa   :  { %v485_v6 = vmax.f32 %v471_v57, %v478_v59  ;;  %v472_v53 = vmax.f32 %v1015_v58, %v426_v51 }
  0xfc   :  { %v496_v48 = vadd.f32 %v1038_v22, %v485_v6  ;;  %v381_v7 = vpop.f32.mrf.mxu2 }
  0xfd   :  { %v460_v8 = vpop.f32.mrf.mxu3 }
  0xfe   :  { %v503_v10 = vmax.f32 %v496_v48, 0.0  ;;  %v461_v11 = vadd.f32 %v460_v8, %v381_v7  ;;  %v349_v12 = vpop.f32.mrf.mxu0 }
  0xff   :  { %v428_v13 = vpop.f32.mrf.mxu1 }
 0x100   :  { %v753_v52 = vpack.c.bf16 %v503_v10, %v502_v9  ;;  %v479_v54 = vmax.f32 %v1017_v61, %v461_v11  ;;  %v429_v14 = vadd.f32 %v428_v13, %v349_v12 }
 0x102   :  { %760 = vst [vmem:[%s1072_s3 + $0x8] sm:$0xff] %v753_v52   ;;  %v486_v55 = vmax.f32 %v472_v53, %v479_v54  ;;  %v473_v20 = vmax.f32 %v411_v17, %v429_v14 }
 0x104   :  { %v384_v15 = vpop.f32.mrf.mxu2  ;;  %v497_v61 = vadd.f32 %v1038_v22, %v486_v55 }
 0x105   :  { %v463_v16 = vpop.f32.mrf.mxu3 }
 0x106   :  { %v464_v19 = vadd.f32 %v463_v16, %v384_v15  ;;  %v351_v58 = vpop.f32.mrf.mxu0  ;;  %v504_v63 = vmax.f32 %v497_v61, 0.0 }
 0x107   :  { %v430_v23 = vpop.f32.mrf.mxu1 }
 0x108   :  { %v480_v21 = vmax.f32 %v446_v18, %v464_v19  ;;  %v431_v26 = vadd.f32 %v430_v23, %v351_v58 }
 0x10a   :  { %v487_v24 = vmax.f32 %v473_v20, %v480_v21  ;;  %v474_v31 = vmax.f32 %v414_v28, %v431_v26 }
 0x10c   :  { %v498_v25 = vadd.f32 %v1038_v22, %v487_v24  ;;  %v386_v27 = vpop.f32.mrf.mxu2 }
 0x10d   :  { %v465_v29 = vpop.f32.mrf.mxu3 }
 0x10e   :  { %v505_v0 = vmax.f32 %v498_v25, 0.0  ;;  %v466_v1 = vadd.f32 %v465_v29, %v386_v27 }
 0x110   :  { %v758_v30 = vpack.c.bf16 %v505_v0, %v504_v63  ;;  %v481_v32 = vmax.f32 %v449_v62, %v466_v1 }
 0x112   :  { %761 = vst [vmem:[%s1072_s3 + $0x10] sm:$0xff] %v758_v30   ;;  %v488_v33 = vmax.f32 %v474_v31, %v481_v32 }
 0x114   :  { %v499_v34 = vadd.f32 %v1038_v22, %v488_v33 }
 0x116   :  { %v506_v35 = vmax.f32 %v499_v34, 0.0 }
 0x118   :  { %v513_v36 = vpack.c.bf16 %v506_v35, %v506_v35 }
 0x11a   :  { %520 = vst [vmem:[%s1072_s3 + $0x18] sm:$0xf] %v513_v36 }

// kernel: net_forward.5
= control target key start
LH: loop header
LB: loop body
LE: loop exit
PB: predicated region body
PF: predicated region fallthrough
CT: control target
= control target key end

     0   :  { %s970_s1 = inlined_call_operand.vmem [shape: bf16[512,128], index: 1, kind: input, shape index: {}]   ;;  %s971_s2 = inlined_call_operand.vmem [shape: f32[1,128], index: 2, kind: input, shape index: {}]   ;;  %s972_s0 = inlined_call_operand.vmem [shape: bf16[8,512], index: 0, kind: input, shape index: {}]   ;;  %s973_s3 = inlined_call_operand.vmem [shape: bf16[128,128], index: 3, kind: input, shape index: {}]   ;;  %s974_s4 = inlined_call_operand.vmem [shape: f32[1,128], index: 4, kind: input, shape index: {}]   ;;  %s975_s5 = inlined_call_operand.vmem [shape: bf16[128,128], index: 5, kind: input, shape index: {}]   ;;  %s976_s6 = inlined_call_operand.vmem [shape: f32[1,128], index: 6, kind: input, shape index: {}]   ;;  %s977_s7 = inlined_call_operand.vmem [shape: f32[8,128], index: 7, kind: output, shape index: {}]  }
   0x1   :  { %v724_v0 = vld [vmem:[%s970_s1 + $0x38] sm:$0xff]  ;;  %v723_v4 = vld [vmem:[%s970_s1 + $0x30] sm:$0xff]  ;;  %v722_v8 = vld [vmem:[%s970_s1 + $0x28] sm:$0xff] }
   0x2   :  { %v732_v1 = vld [vmem:[%s970_s1 + $0x78] sm:$0xff]  ;;  %302 = vmatpush.bf16.msra.mxu0 %v724_v0  ;;  %v731_v5 = vld [vmem:[%s970_s1 + $0x70] sm:$0xff]  ;;  %v730_v9 = vld [vmem:[%s970_s1 + $0x68] sm:$0xff] }
   0x3   :  { %v740_v2 = vld [vmem:[%s970_s1 + $0xb8] sm:$0xff]  ;;  %315 = vmatpush.bf16.msra.mxu1 %v732_v1  ;;  %v739_v6 = vld [vmem:[%s970_s1 + $0xb0] sm:$0xff]  ;;  %v738_v10 = vld [vmem:[%s970_s1 + $0xa8] sm:$0xff] }
   0x4   :  { %v748_v3 = vld [vmem:[%s970_s1 + $0xf8] sm:$0xff]  ;;  %328 = vmatpush.bf16.msra.mxu2 %v740_v2  ;;  %v747_v7 = vld [vmem:[%s970_s1 + $0xf0] sm:$0xff]  ;;  %v746_v11 = vld [vmem:[%s970_s1 + $0xe8] sm:$0xff] }
   0x5   :  { %341 = vmatpush.bf16.msra.mxu3 %v748_v3  ;;  %v721_v12 = vld [vmem:[%s970_s1 + $0x20] sm:$0xff]  ;;  %v720_v16 = vld [vmem:[%s970_s1 + $0x18] sm:$0xff]  ;;  %v719_v20 = vld [vmem:[%s970_s1 + $0x10] sm:$0xff] }
   0x6   :  { %303 = vmatpush.bf16.msra.mxu0 %v723_v4  ;;  %v729_v13 = vld [vmem:[%s970_s1 + $0x60] sm:$0xff]  ;;  %v728_v17 = vld [vmem:[%s970_s1 + $0x58] sm:$0xff]  ;;  %v727_v21 = vld [vmem:[%s970_s1 + $0x50] sm:$0xff] }
   0x7   :  { %316 = vmatpush.bf16.msra.mxu1 %v731_v5  ;;  %v737_v14 = vld [vmem:[%s970_s1 + $0xa0] sm:$0xff]  ;;  %v736_v18 = vld [vmem:[%s970_s1 + $0x98] sm:$0xff]  ;;  %v735_v22 = vld [vmem:[%s970_s1 + $0x90] sm:$0xff] }
   0x8   :  { %329 = vmatpush.bf16.msra.mxu2 %v739_v6  ;;  %v745_v15 = vld [vmem:[%s970_s1 + $0xe0] sm:$0xff]  ;;  %v744_v19 = vld [vmem:[%s970_s1 + $0xd8] sm:$0xff]  ;;  %v743_v23 = vld [vmem:[%s970_s1 + $0xd0] sm:$0xff] }
   0x9   :  { %342 = vmatpush.bf16.msra.mxu3 %v747_v7  ;;  %v718_v24 = vld [vmem:[%s970_s1 + $0x8] sm:$0xff]  ;;  %v26_v26 = vld [vmem:[%s972_s0] sm:$0xff]  ;;  %v756_v38 = vld [vmem:[%s973_s3 + $0x38] sm:$0xff] }
   0xa   :  { %304 = vmatpush.bf16.msra.mxu0 %v722_v8  ;;  %v726_v25 = vld [vmem:[%s970_s1 + $0x48] sm:$0xff]  ;;  %v98_v30 = vunpack.c.l.b16 %v26_v26  ;;  %v99_v31 = vunpack.c.h.b16 %v26_v26  ;;  %v717_v32 = vld [vmem:[%s970_s1] sm:$0xff]  ;;  %v755_v43 = vld [vmem:[%s973_s3 + $0x30] sm:$0xff] }
   0xb   :  { %317 = vmatpush.bf16.msra.mxu1 %v730_v9  ;;  %v734_v27 = vld [vmem:[%s970_s1 + $0x88] sm:$0xff]  ;;  %v725_v33 = vld [vmem:[%s970_s1 + $0x40] sm:$0xff]  ;;  %v752_v46 = vld [vmem:[%s973_s3 + $0x18] sm:$0xff] }
   0xc   :  { %330 = vmatpush.bf16.msra.mxu2 %v738_v10  ;;  %v742_v28 = vld [vmem:[%s970_s1 + $0xc8] sm:$0xff]  ;;  %v733_v36 = vld [vmem:[%s970_s1 + $0x80] sm:$0xff]  ;;  %v102_v39 = vpack.c.b16 %v98_v30, %v98_v30  ;;  %v103_v40 = vpack.c.b16 %v99_v31, %v99_v31  ;;  %v751_v47 = vld [vmem:[%s973_s3 + $0x10] sm:$0xff] }
   0xd   :  { %343 = vmatpush.bf16.msra.mxu3 %v746_v11  ;;  %v27_v29 = vld [vmem:[%s972_s0 + $0x8] sm:$0xff]  ;;  %v741_v37 = vld [vmem:[%s970_s1 + $0xc0] sm:$0xff]  ;;  %v764_v50 = vld [vmem:[%s975_s5 + $0x38] sm:$0xff] }
   0xe   :  { %305 = vmatpush.bf16.msra.mxu0 %v721_v12  ;;  %v100_v34 = vunpack.c.l.b16 %v27_v29  ;;  %v101_v35 = vunpack.c.h.b16 %v27_v29  ;;  %v754_v44 = vld [vmem:[%s973_s3 + $0x28] sm:$0xff]  ;;  %v753_v45 = vld [vmem:[%s973_s3 + $0x20] sm:$0xff]  ;;  %v763_v51 = vld [vmem:[%s975_s5 + $0x30] sm:$0xff] }
   0xf   :  { %318 = vmatpush.bf16.msra.mxu1 %v729_v13  ;;  %v750_v48 = vld [vmem:[%s973_s3 + $0x8] sm:$0xff]  ;;  %v749_v49 = vld [vmem:[%s973_s3] sm:$0xff]  ;;  %v760_v55 = vld [vmem:[%s975_s5 + $0x18] sm:$0xff] }
  0x10   :  { %331 = vmatpush.bf16.msra.mxu2 %v737_v14  ;;  %v104_v41 = vpack.c.b16 %v100_v34, %v100_v34  ;;  %v105_v42 = vpack.c.b16 %v101_v35, %v101_v35  ;;  %v762_v52 = vld [vmem:[%s975_s5 + $0x28] sm:$0xff]  ;;  %v761_v53 = vld [vmem:[%s975_s5 + $0x20] sm:$0xff]  ;;  %v759_v59 = vld [vmem:[%s975_s5 + $0x10] sm:$0xff] }
  0x11   :  { %344 = vmatpush.bf16.msra.mxu3 %v745_v15  ;;  %v765_v54 = vld [vmem:[%s971_s2] ss:$0 sm:$0xff]  ;;  %v758_v7 = vld [vmem:[%s975_s5 + $0x8] sm:$0xff] }
  0x12   :  { %306 = vmatpush.bf16.msra.mxu0 %v720_v16  ;;  %v757_v8 = vld [vmem:[%s975_s5] sm:$0xff] }
  0x13   :  { %319 = vmatpush.bf16.msra.mxu1 %v728_v17  ;;  %v766_v9 = vld [vmem:[%s974_s4] ss:$0 sm:$0xff] }
  0x14   :  { %332 = vmatpush.bf16.msra.mxu2 %v736_v18  ;;  %v767_v15 = vld [vmem:[%s976_s6] ss:$0 sm:$0xff] }
  0x15   :  { %345 = vmatpush.bf16.msra.mxu3 %v744_v19 }
  0x16   :  { %307 = vmatpush.bf16.msra.mxu0 %v719_v20 }
  0x17   :  { %320 = vmatpush.bf16.msra.mxu1 %v727_v21 }
  0x18   :  { %333 = vmatpush.bf16.msra.mxu2 %v735_v22 }
  0x19   :  { %346 = vmatpush.bf16.msra.mxu3 %v743_v23 }
  0x1a   :  { %308 = vmatpush.bf16.msra.mxu0 %v718_v24 }
  0x1b   :  { %321 = vmatpush.bf16.msra.mxu1 %v726_v25 }
  0x1c   :  { %334 = vmatpush.bf16.msra.mxu2 %v734_v27 }
  0x1d   :  { %347 = vmatpush.bf16.msra.mxu3 %v742_v28 }
  0x1e   :  { %309 = vmatpush.bf16.msra.mxu0 %v717_v32 }
  0x1f   :  { %322 = vmatpush.bf16.msra.mxu1 %v725_v33 }
  0x20   :  { %335 = vmatpush.bf16.msra.mxu2 %v733_v36 }
  0x21   :  { %348 = vmatpush.bf16.msra.mxu3 %v741_v37  ;;  %310 = vmatmul.bf16.vlgmr.msra.gmra.mxu0 %v102_v39 }
  0x22   :  { %424 = vmatpush.bf16.msrb.mxu0 %v756_v38  ;;  %323 = vmatmul.bf16.vlgmr.msra.gmra.mxu1 %v103_v40 }
  0x23   :  { %336 = vmatmul.bf16.vlgmr.msra.gmra.mxu2 %v104_v41  ;;  %507 = vmatpush.bf16.msrb.mxu1 %v764_v50 }
  0x24   :  { %349 = vmatmul.bf16.vlgmr.msra.gmra.mxu3 %v105_v42 }
  0x26   :  { %425 = vmatpush.bf16.msrb.mxu0 %v755_v43 }
  0x27   :  { %508 = vmatpush.bf16.msrb.mxu1 %v763_v51 }
  0x2a   :  { %426 = vmatpush.bf16.msrb.mxu0 %v754_v44 }
  0x2b   :  { %509 = vmatpush.bf16.msrb.mxu1 %v762_v52 }
  0x2e   :  { %427 = vmatpush.bf16.msrb.mxu0 %v753_v45 }
  0x2f   :  { %510 = vmatpush.bf16.msrb.mxu1 %v761_v53 }
  0x32   :  { %428 = vmatpush.bf16.msrb.mxu0 %v752_v46 }
  0x33   :  { %511 = vmatpush.bf16.msrb.mxu1 %v760_v55 }
  0x36   :  { %429 = vmatpush.bf16.msrb.mxu0 %v751_v47 }
  0x37   :  { %512 = vmatpush.bf16.msrb.mxu1 %v759_v59 }
  0x3a   :  { %430 = vmatpush.bf16.msrb.mxu0 %v750_v48 }
  0x3b   :  { %513 = vmatpush.bf16.msrb.mxu1 %v758_v7 }
  0x3e   :  { %431 = vmatpush.bf16.msrb.mxu0 %v749_v49 }
  0x3f   :  { %514 = vmatpush.bf16.msrb.mxu1 %v757_v8 }
  0x9e   :  { %v311_v56 = vpop.f32.mrf.mxu0 }
  0x9f   :  { %v324_v57 = vpop.f32.mrf.mxu1  ;;  %v312_v58 = vadd.f32 %v765_v54, %v311_v56 }
  0xa1   :  { %v325_v60 = vadd.f32 %v324_v57, %v312_v58 }
  0xa6   :  { %v337_v61 = vpop.f32.mrf.mxu2  ;;  %v313_v0 = vpop.f32.mrf.mxu0 }
  0xa7   :  { %v350_v62 = vpop.f32.mrf.mxu3  ;;  %v338_v63 = vadd.f32 %v337_v61, %v325_v60  ;;  %v326_v1 = vpop.f32.mrf.mxu1 }
  0xa9   :  { %v351_v2 = vadd.f32 %v350_v62, %v338_v63 }
  0xab   :  { %v354_v3 = vmax.f32 %v351_v2, 0.0 }
  0xad   :  { %v355_v4 = vpack.c.bf16 %v354_v3, %v354_v3 }
  0xae   :  { %v339_v5 = vpop.f32.mrf.mxu2 }
  0xaf   :  { %v352_v6 = vpop.f32.mrf.mxu3  ;;  %432 = vmatmul.bf16.vlgmr.msrb.gmra.mxu0 %v355_v4 }
 0x12c   :  { %v433_v10 = vpop.f32.mrf.mxu0 }
 0x12d   :  { %v434_v11 = vadd.f32 %v766_v9, %v433_v10 }
 0x12f   :  { %v437_v12 = vmax.f32 %v434_v11, 0.0 }
 0x131   :  { %v438_v13 = vpack.c.bf16 %v437_v12, %v437_v12 }
 0x133   :  { %515 = vmatmul.bf16.vlgmr.msrb.gmra.mxu1 %v438_v13 }
 0x134   :  { %v435_v14 = vpop.f32.mrf.mxu0 }
 0x1b0   :  { %v516_v16 = vpop.f32.mrf.mxu1 }
 0x1b1   :  { %v517_v17 = vadd.f32 %v767_v15, %v516_v16 }
 0x1b3   :  { %520 = vst [vmem:[%s977_s7] sm:$0xff] %v517_v17 }
 0x1b8   :  { %v518_v18 = vpop.f32.mrf.mxu1 }

</bundles_post_ra>
